<compile_context>
chip_gen: v7x
topology: tpu7x:2x2x1
jax: 0.10.0
libtpu: 0.0.40
codegen_flags: <defaults>
</compile_context>

<pallas_src>
import functools

import jax
import jax.numpy as jnp
import numpy as np
from jax.experimental import pallas as pl
from jax.experimental.pallas import tpu as pltpu


# ----------------------------------------------------------------------------
# helpers
# ----------------------------------------------------------------------------
def _round_up(x, m):
    return ((x + m - 1) // m) * m


_VMEM_CAP = None


def _vmem_cap():
    """~3/4 of physical VMEM: ~48 MiB on v7x (64 MiB/TC), ~96 MiB on v5e/v6e."""
    global _VMEM_CAP
    if _VMEM_CAP is None:
        try:
            _VMEM_CAP = int(pltpu.get_tpu_info().vmem_capacity_bytes * 3 // 4)
        except Exception:
            _VMEM_CAP = 48 << 20          # conservative fallback (v7x-safe)
    return _VMEM_CAP
    

def _compiler_params(block_bytes, semantics):
    # double-buffered pipeline + compiler scratch headroom, capped per chip.
    limit = int(min(max(2 * block_bytes + (8 << 20), 16 << 20), _vmem_cap()))
    return pltpu.CompilerParams(dimension_semantics=semantics,
                                vmem_limit_bytes=limit)


def _elementwise_tile(mp, mt, target=1024):
    """Largest multiple of mt that divides mp and is <= target (rows)."""
    nt = mp // mt
    for d in range(nt, 0, -1):
        if nt % d == 0 and d * mt <= target:
            return d * mt
    return mt


# ----------------------------------------------------------------------------
# Kernel 1: conv-as-matmul (MXU, bf16 in / f32 acc), bf16 writeback (optional)
#           + per-tile BN partial sums (sum, sum-of-squares)
# ----------------------------------------------------------------------------
def _conv_stats_kernel(p_ref, w_ref, *out_refs, write_conv):
    conv = jnp.dot(p_ref[...], w_ref[...], preferred_element_type=jnp.float32)
    if write_conv:
        conv_ref, stats_ref = out_refs
        conv_ref[...] = conv.astype(conv_ref.dtype)
    else:
        (stats_ref,) = out_refs
    # Padded patch rows are exactly zero, so unmasked sums are already the
    # valid-row sums (statistics come from the f32 accumulator, not the bf16
    # writeback).
    s = jnp.sum(conv, axis=0, keepdims=True)             # [1, Cp]
    ss = jnp.sum(conv * conv, axis=0, keepdims=True)     # [1, Cp]
    stats_ref[...] = jnp.concatenate([s, ss], axis=0)[None]


def conv_stats(patches, w, *, m_tile, write_conv=True):
    """patches: bf16 [Mp, Kp] (Mp % m_tile == 0); w: bf16 [Kp, Cp]."""
    mp, kp = patches.shape
    cp = w.shape[1]
    nt = mp // m_tile
    kernel = functools.partial(_conv_stats_kernel, write_conv=write_conv)

    stats_sds = jax.ShapeDtypeStruct((nt, 2, cp), jnp.float32)
    stats_spec = pl.BlockSpec((1, 2, cp), lambda i: (i, 0, 0))
    if write_conv:
        out_shape = (jax.ShapeDtypeStruct((mp, cp), jnp.bfloat16), stats_sds)
        out_specs = (pl.BlockSpec((m_tile, cp), lambda i: (i, 0)), stats_spec)
    else:
        out_shape = stats_sds
        out_specs = stats_spec

    block_bytes = (m_tile * kp * 2 + kp * cp * 2
                   + (m_tile * cp * 2 if write_conv else 0) + 2 * cp * 4)
    outs = pl.pallas_call(
        kernel,
        out_shape=out_shape,
        grid_spec=pltpu.PrefetchScalarGridSpec(
            num_scalar_prefetch=0,
            grid=(nt,),
            in_specs=[
                pl.BlockSpec((m_tile, kp), lambda i: (i, 0)),
                pl.BlockSpec((kp, cp), lambda i: (0, 0)),   # weight resident
            ],
            out_specs=out_specs),
        compiler_params=_compiler_params(block_bytes, ("parallel",)),
    )(patches, w)
    if write_conv:
        return outs                     # (conv_bf16, stats)
    return None, outs


# ----------------------------------------------------------------------------
# Kernel 2: BN affine (+ optional residual: precomputed tensor OR in-kernel
#           1x1 shortcut conv recompute) (+ ReLU)
# ----------------------------------------------------------------------------
def _bn_act_kernel(*refs, relu, res_mode):
    if res_mode == "conv1x1":
        (conv_ref, scale_ref, shift_ref,
         xs_ref, ws_ref, rscale_ref, rshift_ref, o_ref) = refs
    elif res_mode == "tensor":
        (conv_ref, scale_ref, shift_ref,
         r_ref, rscale_ref, rshift_ref, o_ref) = refs
    else:
        conv_ref, scale_ref, shift_ref, o_ref = refs

    y = conv_ref[...].astype(jnp.float32) * scale_ref[...] + shift_ref[...]
    if res_mode == "conv1x1":
        # recompute the 1x1 shortcut conv on the MXU instead of reading a
        # precomputed [M, Cp] tensor from HBM
        r = jnp.dot(xs_ref[...], ws_ref[...],
                    preferred_element_type=jnp.float32)
        y = y + r * rscale_ref[...] + rshift_ref[...]
    elif res_mode == "tensor":
        y = y + (r_ref[...].astype(jnp.float32) * rscale_ref[...]
                 + rshift_ref[...])
    if relu:
        y = jnp.maximum(y, 0.0)
    o_ref[...] = y.astype(o_ref.dtype)


def bn_act(conv, scale, shift, *, m_tile, relu, out_dtype,
           residual=None, rscale=None, rshift=None, res_x=None, res_w=None):
    mp, cp = conv.shape
    nt = mp // m_tile
    if res_x is not None:
        res_mode = "conv1x1"
    elif residual is not None:
        res_mode = "tensor"
    else:
        res_mode = None
    kernel = functools.partial(_bn_act_kernel, relu=relu, res_mode=res_mode)

    row_spec = pl.BlockSpec((m_tile, cp), lambda i: (i, 0))
    vec_spec = pl.BlockSpec((1, cp), lambda i: (0, 0))
    in_specs = [row_spec, vec_spec, vec_spec]
    args = [conv, scale, shift]
    out_bytes = np.dtype(out_dtype).itemsize
    block_bytes = m_tile * cp * (2 + out_bytes) + 2 * cp * 4
    if res_mode == "conv1x1":
        kin = res_x.shape[1]
        in_specs += [pl.BlockSpec((m_tile, kin), lambda i: (i, 0)),
                     pl.BlockSpec((kin, cp), lambda i: (0, 0)),
                     vec_spec, vec_spec]
        args += [res_x, res_w, rscale, rshift]
        block_bytes += m_tile * kin * 2 + kin * cp * 2 + 2 * cp * 4
    elif res_mode == "tensor":
        in_specs += [row_spec, vec_spec, vec_spec]
        args += [residual, rscale, rshift]
        block_bytes += m_tile * cp * 2 + 2 * cp * 4

    return pl.pallas_call(
        kernel,
        out_shape=jax.ShapeDtypeStruct((mp, cp), out_dtype),
        grid_spec=pltpu.PrefetchScalarGridSpec(
            num_scalar_prefetch=0,
            grid=(nt,),
            in_specs=in_specs,
            out_specs=row_spec),
        compiler_params=_compiler_params(block_bytes, ("parallel",)),
    )(*args)


# ----------------------------------------------------------------------------
# BN scale/shift from per-tile partials (Chan's parallel mean/M2 combination)
# ----------------------------------------------------------------------------
def bn_scale_shift(stats, gamma_p, beta_p, m_true, m_tile, eps=1e-5):
    """stats: [nt, 2, Cp] with row0 = per-tile sum, row1 = per-tile sum-sq."""
    nt = stats.shape[0]
    n = np.full((nt,), float(m_tile), np.float32)
    n[-1] = float(m_true - (nt - 1) * m_tile)      # valid rows in last tile
    n = jnp.asarray(n)[:, None]                    # [nt, 1]
    s = stats[:, 0, :]                             # [nt, Cp]
    ss = stats[:, 1, :]                            # [nt, Cp]
    mu_i = s / n                                   # per-tile mean
    m2_i = jnp.maximum(ss - s * mu_i, 0.0)         # per-tile sum((x-mu_i)^2)
    mean = jnp.sum(s, axis=0) / m_true
    m2 = jnp.sum(m2_i, axis=0) + jnp.sum(n * (mu_i - mean) ** 2, axis=0)
    var = jnp.maximum(m2 / m_true, 0.0)
    scale = gamma_p * jax.lax.rsqrt(var + eps)
    shift = beta_p - mean * scale
    return scale[None, :], shift[None, :]


# ----------------------------------------------------------------------------
# Plain-JAX glue: im2col (on an already bf16 / channel-padded NHWC tensor),
# weight reshape/padding.
# ----------------------------------------------------------------------------
def im2col(x_nhwc, kh, kw, stride, padding):
    b, h, w, c = x_nhwc.shape
    xp = jnp.pad(x_nhwc, ((0, 0), (padding, padding), (padding, padding),
                          (0, 0)))
    ho = (h + 2 * padding - kh) // stride + 1
    wo = (w + 2 * padding - kw) // stride + 1
    cols = []
    for i in range(kh):
        for j in range(kw):
            cols.append(xp[:, i:i + (ho - 1) * stride + 1:stride,
                           j:j + (wo - 1) * stride + 1:stride, :])
    p = jnp.concatenate(cols, axis=-1)
    return p.reshape(b * ho * wo, kh * kw * c), (b, ho, wo)


def _prep_conv(w_oihw, gamma, beta, cp_in, cp_out):
    """Pad Cin/Cout to lane-dense sizes, reshape to im2col [kh*kw*cp_in, cp_out]."""
    cout, cin, kh, kw = w_oihw.shape
    wp = jnp.pad(w_oihw, ((0, cp_out - cout), (0, cp_in - cin), (0, 0), (0, 0)))
    wm = jnp.transpose(wp, (2, 3, 1, 0)).reshape(kh * kw * cp_in, cp_out)
    gp = jnp.pad(gamma, (0, cp_out - gamma.shape[0]), constant_values=1.0)
    bp = jnp.pad(beta, (0, cp_out - beta.shape[0]))
    return wm.astype(jnp.bfloat16), gp, bp


def _pad_rows(a, rows):
    return jnp.pad(a, ((0, rows - a.shape[0]), (0, 0)))


# ----------------------------------------------------------------------------
# EncoderBlock forward (matches the PyTorch module, training-mode BatchNorm)
# ----------------------------------------------------------------------------
def encoder_block_forward(x_nhwc, params, stride, padding=1, *,
                          m_tile=512, eps=1e-5):
    b, h, w, cin = x_nhwc.shape
    cout = cin * stride
    cp = _round_up(cout, 128)        # lane-dense output channels
    cpi = _round_up(cin, 128)        # lane-dense input channels

    # cast + channel-pad the activation BEFORE im2col: patches are born bf16
    # and lane-aligned, no second pad/cast pass over the 9x patch matrix.
    xb = jnp.pad(x_nhwc, ((0, 0), (0, 0), (0, 0),
                          (0, cpi - cin))).astype(jnp.bfloat16)

    # --- block[0:3]: Conv3x3(stride) -> BN -> ReLU --------------------------
    p1, (b_, ho, wo) = im2col(xb, 3, 3, stride, padding)     # bf16 [M1, 9*cpi]
    m1 = p1.shape[0]
    mt = min(m_tile, _round_up(m1, 16))      # 16-row multiple (bf16 sublanes)
    mp1 = _round_up(m1, mt)
    p1 = _pad_rows(p1, mp1)
    w1p, g1p, b1p = _prep_conv(params["w1"], params["g1"], params["b1"],
                               cpi, cp)
    conv1, st1 = conv_stats(p1, w1p, m_tile=mt)              # bf16 conv out
    sc1, sh1 = bn_scale_shift(st1, g1p, b1p, m1, mt, eps)
    et1 = _elementwise_tile(mp1, mt)
    y1 = bn_act(conv1, sc1, sh1, m_tile=et1, relu=True,
                out_dtype=jnp.bfloat16)                      # bf16 [mp1, cp]
    # keep all cp channels (padded channels are exactly 0 after BN/ReLU), so
    # conv2's patches need no re-pad / re-cast.
    y1_nhwc = y1[:m1].reshape(b_, ho, wo, cp)

    # --- block[3:5]: Conv3x3(stride=1) -> BN --------------------------------
    p2, _ = im2col(y1_nhwc, 3, 3, 1, padding)                # bf16 [M2, 9*cp]
    m2 = p2.shape[0]                                         # == m1
    mp2 = _round_up(m2, mt)
    p2 = _pad_rows(p2, mp2)
    w2p, g2p, b2p = _prep_conv(params["w2"], params["g2"], params["b2"],
                               cp, cp)
    conv2, st2 = conv_stats(p2, w2p, m_tile=mt)
    sc2, sh2 = bn_scale_shift(st2, g2p, b2p, m2, mt, eps)
    et2 = _elementwise_tile(mp2, mt)

    # --- shortcut + final fused add/ReLU ------------------------------------
    if stride == 1:
        assert cout == cin, "identity shortcut requires cout == cin"
        # identity shortcut: bf16, channel-padded x (no f32 round-trip)
        res = _pad_rows(xb.reshape(-1, cpi), mp2)
        res = jnp.pad(res, ((0, 0), (0, cp - cpi)))
        rsc = jnp.ones((1, cp), jnp.float32)
        rsh = jnp.zeros((1, cp), jnp.float32)
        out = bn_act(conv2, sc2, sh2, m_tile=et2, relu=True,
                     out_dtype=jnp.float32,
                     residual=res, rscale=rsc, rshift=rsh)
    else:
        # 1x1-conv shortcut: stats-only pass for its BN statistics, then the
        # conv itself is recomputed inside the final fused kernel.
        xs = xb[:, ::stride, ::stride, :].reshape(-1, cpi)   # bf16 [m2, cpi]
        xs = _pad_rows(xs, mp2)
        wsp, gsp, bsp = _prep_conv(params["ws"], params["gs"], params["bs"],
                                   cpi, cp)
        _, sts = conv_stats(xs, wsp, m_tile=mt, write_conv=False)
        rsc, rsh = bn_scale_shift(sts, gsp, bsp, m2, mt, eps)
        out = bn_act(conv2, sc2, sh2, m_tile=et2, relu=True,
                     out_dtype=jnp.float32,
                     res_x=xs, res_w=wsp, rscale=rsc, rshift=rsh)

    return out[:m2, :cout].reshape(b_, ho, wo, cout)


# ----------------------------------------------------------------------------
# Pure-JAX references for verification
# ----------------------------------------------------------------------------
def ref_conv(x_nhwc, w_oihw, stride, padding, mxu_dtype=None):
    if mxu_dtype is not None:
        x_nhwc = x_nhwc.astype(mxu_dtype)
        w_oihw = w_oihw.astype(mxu_dtype)
    w_hwio = jnp.transpose(w_oihw, (2, 3, 1, 0))
    return jax.lax.conv_general_dilated(
        x_nhwc, w_hwio, (stride, stride),
        [(padding, padding), (padding, padding)],
        dimension_numbers=("NHWC", "HWIO", "NHWC"),
        preferred_element_type=jnp.float32)


def ref_bn(x, gamma, beta, eps=1e-5):
    mean = jnp.mean(x, axis=(0, 1, 2), keepdims=True)
    var = jnp.mean((x - mean) ** 2, axis=(0, 1, 2), keepdims=True)
    return (x - mean) * jax.lax.rsqrt(var + eps) * gamma + beta


def ref_forward(x_nhwc, params, stride, padding=1, mxu_dtype=None):
    y = jax.nn.relu(ref_bn(ref_conv(x_nhwc, params["w1"], stride, padding,
                                    mxu_dtype),
                           params["g1"], params["b1"]))
    y = ref_bn(ref_conv(y, params["w2"], 1, padding, mxu_dtype),
               params["g2"], params["b2"])
    if stride == 1:
        s = (x_nhwc.astype(mxu_dtype).astype(jnp.float32)
             if mxu_dtype is not None else x_nhwc)
    else:
        s = ref_bn(ref_conv(x_nhwc, params["ws"], stride, 0, mxu_dtype),
                   params["gs"], params["bs"])
    return jax.nn.relu(y + s)


# ----------------------------------------------------------------------------
def make_params(key, in_channel, stride):
    cout = in_channel * stride
    ks = jax.random.split(key, 9)
    p = {
        "w1": 0.1 * jax.random.normal(ks[0], (cout, in_channel, 3, 3),
                                      jnp.float32),
        "g1": 1.0 + 0.1 * jax.random.normal(ks[1], (cout,), jnp.float32),
        "b1": 0.1 * jax.random.normal(ks[2], (cout,), jnp.float32),
        "w2": 0.1 * jax.random.normal(ks[3], (cout, cout, 3, 3), jnp.float32),
        "g2": 1.0 + 0.1 * jax.random.normal(ks[4], (cout,), jnp.float32),
        "b2": 0.1 * jax.random.normal(ks[5], (cout,), jnp.float32),
    }
    if stride != 1:
        p["ws"] = 0.1 * jax.random.normal(ks[6], (cout, in_channel, 1, 1),
                                          jnp.float32)
        p["gs"] = 1.0 + 0.1 * jax.random.normal(ks[7], (cout,), jnp.float32)
        p["bs"] = 0.1 * jax.random.normal(ks[8], (cout,), jnp.float32)
    return p


if __name__ == "__main__":
    key = jax.random.PRNGKey(0)
    kx, kp1, kp2 = jax.random.split(key, 3)

    # PyTorch-convention NCHW input, small shapes
    x_nchw = jax.random.normal(kx, (2, 4, 16, 16), jnp.float32)
    x_nhwc = jnp.transpose(x_nchw, (0, 2, 3, 1))

    fwd = jax.jit(encoder_block_forward,
                  static_argnames=("stride", "padding", "m_tile", "eps"))

    ok = True
    for stride, pk in ((2, kp1), (1, kp2)):
        params = make_params(pk, in_channel=4, stride=stride)
        out = np.asarray(jax.block_until_ready(
            fwd(x_nhwc, params, stride=stride, padding=1)))
        # precision-matched reference: bf16 MXU operands, f32 accumulate,
        # bf16 intermediate between the two convs
        ref_b = np.asarray(jax.block_until_ready(
            ref_forward(x_nhwc, params, stride, 1, mxu_dtype=jnp.bfloat16)))
        # pure-f32 reference: only bf16 rounding separates the two
        ref_f = np.asarray(jax.block_until_ready(
            ref_forward(x_nhwc, params, stride, 1)))
        if not np.allclose(out, ref_b, atol=5e-2, rtol=5e-2):
            ok = False
        if not np.allclose(out, ref_f, atol=2e-1, rtol=2e-1):
            ok = False

    if ok:
        print("KERNEL_OK")
    else:
        raise SystemExit("mismatch vs reference")
</pallas_src>

<mosaic_0001>
module attributes {stable_mosaic.version = 11 : i64} {
  func.func @_conv_stats_kernel(%arg0: i32, %arg1: memref<128x1152xbf16, #tpu.memory_space<vmem>>, %arg2: memref<1152x128xbf16, #tpu.memory_space<vmem>>, %arg3: memref<128x128xbf16, #tpu.memory_space<vmem>>, %arg4: memref<1x2x128xf32, #tpu.memory_space<vmem>>) attributes {dimension_semantics = [#tpu.dimension_semantics<parallel>], iteration_bounds = array<i64: 1>, scalar_prefetch = 0 : i64, scratch_operands = 0 : i64, tpu.core_type = #tpu.core_type<tc>, window_params = [{transform_indices = @transform_0, window_bounds = array<i64: 128, 1152>}, {pipeline_mode = #tpu.pipeline_mode<synchronous>, transform_indices = @transform_1, window_bounds = array<i64: 1152, 128>}, {transform_indices = @transform_2, window_bounds = array<i64: 128, 128>}, {transform_indices = @transform_3, window_bounds = array<i64: 1, 2, 128>}]} {
    %c0 = arith.constant 0 : index
    %c0_0 = arith.constant 0 : index
    %0 = vector.load %arg1[%c0, %c0_0] : memref<128x1152xbf16, #tpu.memory_space<vmem>>, vector<128x1152xbf16>
    %c0_1 = arith.constant 0 : index
    %c0_2 = arith.constant 0 : index
    %1 = vector.load %arg2[%c0_1, %c0_2] : memref<1152x128xbf16, #tpu.memory_space<vmem>>, vector<1152x128xbf16>
    %cst = arith.constant dense<0.000000e+00> : vector<128x128xf32>
    %2 = tpu.matmul %0, %1, %cst {dimension_numbers = #tpu.dot_dimension_numbers<[1], [0], [0], [1], [0, 0, 1, 1], [], []>} : vector<128x1152xbf16>, vector<1152x128xbf16>, vector<128x128xf32> -> vector<128x128xf32>
    %3 = arith.truncf %2 : vector<128x128xf32> to vector<128x128xbf16>
    %c0_3 = arith.constant 0 : index
    %c0_4 = arith.constant 0 : index
    %4 = vector.load %arg3[%c0_3, %c0_4] : memref<128x128xbf16, #tpu.memory_space<vmem>>, vector<128x128xbf16>
    tpu.vector_store %arg3[%c0_3, %c0_4], %3 {strides = array<i32>} : memref<128x128xbf16, #tpu.memory_space<vmem>>, vector<128x128xbf16>,
    %cst_5 = arith.constant dense<0.000000e+00> : vector<128xf32>
    %5 = vector.multi_reduction <add>, %2, %cst_5 [0] : vector<128x128xf32> to vector<128xf32>
    %6 = vector.shape_cast %5 : vector<128xf32> to vector<1x128xf32>
    %7 = arith.mulf %2, %2 : vector<128x128xf32>
    %cst_6 = arith.constant dense<0.000000e+00> : vector<128xf32>
    %8 = vector.multi_reduction <add>, %7, %cst_6 [0] : vector<128x128xf32> to vector<128xf32>
    %9 = vector.shape_cast %8 : vector<128xf32> to vector<1x128xf32>
    %10 = tpu.concatenate %6, %9 in 0 : vector<1x128xf32>, vector<1x128xf32> -> vector<2x128xf32>
    %11 = vector.shape_cast %10 : vector<2x128xf32> to vector<1x2x128xf32>
    %c0_7 = arith.constant 0 : index
    %c0_8 = arith.constant 0 : index
    %c0_9 = arith.constant 0 : index
    %12 = vector.load %arg4[%c0_7, %c0_8, %c0_9] : memref<1x2x128xf32, #tpu.memory_space<vmem>>, vector<1x2x128xf32>
    tpu.vector_store %arg4[%c0_7, %c0_8, %c0_9], %11 {strides = array<i32>} : memref<1x2x128xf32, #tpu.memory_space<vmem>>, vector<1x2x128xf32>,
    return
  }
  func.func @transform_0(%arg0: i32) -> (i32, i32) {
    %c0_i32 = arith.constant 0 : i32
    %c0_i32_0 = arith.constant 0 : i32
    return %arg0, %c0_i32 : i32, i32
  }
  func.func @transform_1(%arg0: i32) -> (i32, i32) {
    %c0_i32 = arith.constant 0 : i32
    %c0_i32_0 = arith.constant 0 : i32
    %c0_i32_1 = arith.constant 0 : i32
    return %c0_i32, %c0_i32_0 : i32, i32
  }
  func.func @transform_2(%arg0: i32) -> (i32, i32) {
    %c0_i32 = arith.constant 0 : i32
    %c0_i32_0 = arith.constant 0 : i32
    return %arg0, %c0_i32 : i32, i32
  }
  func.func @transform_3(%arg0: i32) -> (i32, i32, i32) {
    %c0_i32 = arith.constant 0 : i32
    %c0_i32_0 = arith.constant 0 : i32
    %c0_i32_1 = arith.constant 0 : i32
    return %arg0, %c0_i32, %c0_i32_0 : i32, i32, i32
  }
}

module attributes {stable_mosaic.version = 11 : i64} {
  func.func @_bn_act_kernel(%arg0: i32, %arg1: memref<128x128xbf16, #tpu.memory_space<vmem>>, %arg2: memref<1x128xf32, #tpu.memory_space<vmem>>, %arg3: memref<1x128xf32, #tpu.memory_space<vmem>>, %arg4: memref<128x128xbf16, #tpu.memory_space<vmem>>) attributes {dimension_semantics = [#tpu.dimension_semantics<parallel>], iteration_bounds = array<i64: 1>, scalar_prefetch = 0 : i64, scratch_operands = 0 : i64, tpu.core_type = #tpu.core_type<tc>, window_params = [{transform_indices = @transform_0, window_bounds = array<i64: 128, 128>}, {pipeline_mode = #tpu.pipeline_mode<synchronous>, transform_indices = @transform_1, window_bounds = array<i64: 1, 128>}, {pipeline_mode = #tpu.pipeline_mode<synchronous>, transform_indices = @transform_2, window_bounds = array<i64: 1, 128>}, {transform_indices = @transform_3, window_bounds = array<i64: 128, 128>}]} {
    %c0 = arith.constant 0 : index
    %c0_0 = arith.constant 0 : index
    %0 = vector.load %arg1[%c0, %c0_0] : memref<128x128xbf16, #tpu.memory_space<vmem>>, vector<128x128xbf16>
    %1 = arith.extf %0 : vector<128x128xbf16> to vector<128x128xf32>
    %c0_1 = arith.constant 0 : index
    %c0_2 = arith.constant 0 : index
    %2 = vector.load %arg2[%c0_1, %c0_2] : memref<1x128xf32, #tpu.memory_space<vmem>>, vector<1x128xf32>
    %3 = vector.broadcast %2 : vector<1x128xf32> to vector<128x128xf32>
    %4 = arith.mulf %1, %3 : vector<128x128xf32>
    %c0_3 = arith.constant 0 : index
    %c0_4 = arith.constant 0 : index
    %5 = vector.load %arg3[%c0_3, %c0_4] : memref<1x128xf32, #tpu.memory_space<vmem>>, vector<1x128xf32>
    %6 = vector.broadcast %5 : vector<1x128xf32> to vector<128x128xf32>
    %7 = arith.addf %4, %6 : vector<128x128xf32>
    %cst = arith.constant 0.000000e+00 : f32
    %8 = vector.broadcast %cst : f32 to vector<128x128xf32>
    %9 = arith.maximumf %7, %8 : vector<128x128xf32>
    %10 = arith.truncf %9 : vector<128x128xf32> to vector<128x128xbf16>
    %c0_5 = arith.constant 0 : index
    %c0_6 = arith.constant 0 : index
    %11 = vector.load %arg4[%c0_5, %c0_6] : memref<128x128xbf16, #tpu.memory_space<vmem>>, vector<128x128xbf16>
    tpu.vector_store %arg4[%c0_5, %c0_6], %10 {strides = array<i32>} : memref<128x128xbf16, #tpu.memory_space<vmem>>, vector<128x128xbf16>,
    return
  }
  func.func @transform_0(%arg0: i32) -> (i32, i32) {
    %c0_i32 = arith.constant 0 : i32
    %c0_i32_0 = arith.constant 0 : i32
    return %arg0, %c0_i32 : i32, i32
  }
  func.func @transform_1(%arg0: i32) -> (i32, i32) {
    %c0_i32 = arith.constant 0 : i32
    %c0_i32_0 = arith.constant 0 : i32
    %c0_i32_1 = arith.constant 0 : i32
    return %c0_i32, %c0_i32_0 : i32, i32
  }
  func.func @transform_2(%arg0: i32) -> (i32, i32) {
    %c0_i32 = arith.constant 0 : i32
    %c0_i32_0 = arith.constant 0 : i32
    %c0_i32_1 = arith.constant 0 : i32
    return %c0_i32, %c0_i32_0 : i32, i32
  }
  func.func @transform_3(%arg0: i32) -> (i32, i32) {
    %c0_i32 = arith.constant 0 : i32
    %c0_i32_0 = arith.constant 0 : i32
    return %arg0, %c0_i32 : i32, i32
  }
}

module attributes {stable_mosaic.version = 11 : i64} {
  func.func @_conv_stats_kernel(%arg0: i32, %arg1: memref<128x128xbf16, #tpu.memory_space<vmem>>, %arg2: memref<128x128xbf16, #tpu.memory_space<vmem>>, %arg3: memref<1x2x128xf32, #tpu.memory_space<vmem>>) attributes {dimension_semantics = [#tpu.dimension_semantics<parallel>], iteration_bounds = array<i64: 1>, scalar_prefetch = 0 : i64, scratch_operands = 0 : i64, tpu.core_type = #tpu.core_type<tc>, window_params = [{transform_indices = @transform_0, window_bounds = array<i64: 128, 128>}, {pipeline_mode = #tpu.pipeline_mode<synchronous>, transform_indices = @transform_1, window_bounds = array<i64: 128, 128>}, {transform_indices = @transform_2, window_bounds = array<i64: 1, 2, 128>}]} {
    %c0 = arith.constant 0 : index
    %c0_0 = arith.constant 0 : index
    %0 = vector.load %arg1[%c0, %c0_0] : memref<128x128xbf16, #tpu.memory_space<vmem>>, vector<128x128xbf16>
    %c0_1 = arith.constant 0 : index
    %c0_2 = arith.constant 0 : index
    %1 = vector.load %arg2[%c0_1, %c0_2] : memref<128x128xbf16, #tpu.memory_space<vmem>>, vector<128x128xbf16>
    %cst = arith.constant dense<0.000000e+00> : vector<128x128xf32>
    %2 = tpu.matmul %0, %1, %cst {dimension_numbers = #tpu.dot_dimension_numbers<[1], [0], [0], [1], [0, 0, 1, 1], [], []>} : vector<128x128xbf16>, vector<128x128xbf16>, vector<128x128xf32> -> vector<128x128xf32>
    %cst_3 = arith.constant dense<0.000000e+00> : vector<128xf32>
    %3 = vector.multi_reduction <add>, %2, %cst_3 [0] : vector<128x128xf32> to vector<128xf32>
    %4 = vector.shape_cast %3 : vector<128xf32> to vector<1x128xf32>
    %5 = arith.mulf %2, %2 : vector<128x128xf32>
    %cst_4 = arith.constant dense<0.000000e+00> : vector<128xf32>
    %6 = vector.multi_reduction <add>, %5, %cst_4 [0] : vector<128x128xf32> to vector<128xf32>
    %7 = vector.shape_cast %6 : vector<128xf32> to vector<1x128xf32>
    %8 = tpu.concatenate %4, %7 in 0 : vector<1x128xf32>, vector<1x128xf32> -> vector<2x128xf32>
    %9 = vector.shape_cast %8 : vector<2x128xf32> to vector<1x2x128xf32>
    %c0_5 = arith.constant 0 : index
    %c0_6 = arith.constant 0 : index
    %c0_7 = arith.constant 0 : index
    %10 = vector.load %arg3[%c0_5, %c0_6, %c0_7] : memref<1x2x128xf32, #tpu.memory_space<vmem>>, vector<1x2x128xf32>
    tpu.vector_store %arg3[%c0_5, %c0_6, %c0_7], %9 {strides = array<i32>} : memref<1x2x128xf32, #tpu.memory_space<vmem>>, vector<1x2x128xf32>,
    return
  }
  func.func @transform_0(%arg0: i32) -> (i32, i32) {
    %c0_i32 = arith.constant 0 : i32
    %c0_i32_0 = arith.constant 0 : i32
    return %arg0, %c0_i32 : i32, i32
  }
  func.func @transform_1(%arg0: i32) -> (i32, i32) {
    %c0_i32 = arith.constant 0 : i32
    %c0_i32_0 = arith.constant 0 : i32
    %c0_i32_1 = arith.constant 0 : i32
    return %c0_i32, %c0_i32_0 : i32, i32
  }
  func.func @transform_2(%arg0: i32) -> (i32, i32, i32) {
    %c0_i32 = arith.constant 0 : i32
    %c0_i32_0 = arith.constant 0 : i32
    %c0_i32_1 = arith.constant 0 : i32
    return %arg0, %c0_i32, %c0_i32_0 : i32, i32, i32
  }
}

module attributes {stable_mosaic.version = 11 : i64} {
  func.func @_bn_act_kernel(%arg0: i32, %arg1: memref<128x128xbf16, #tpu.memory_space<vmem>>, %arg2: memref<1x128xf32, #tpu.memory_space<vmem>>, %arg3: memref<1x128xf32, #tpu.memory_space<vmem>>, %arg4: memref<128x128xbf16, #tpu.memory_space<vmem>>, %arg5: memref<128x128xbf16, #tpu.memory_space<vmem>>, %arg6: memref<1x128xf32, #tpu.memory_space<vmem>>, %arg7: memref<1x128xf32, #tpu.memory_space<vmem>>, %arg8: memref<128x128xf32, #tpu.memory_space<vmem>>) attributes {dimension_semantics = [#tpu.dimension_semantics<parallel>], iteration_bounds = array<i64: 1>, scalar_prefetch = 0 : i64, scratch_operands = 0 : i64, tpu.core_type = #tpu.core_type<tc>, window_params = [{transform_indices = @transform_0, window_bounds = array<i64: 128, 128>}, {pipeline_mode = #tpu.pipeline_mode<synchronous>, transform_indices = @transform_1, window_bounds = array<i64: 1, 128>}, {pipeline_mode = #tpu.pipeline_mode<synchronous>, transform_indices = @transform_2, window_bounds = array<i64: 1, 128>}, {transform_indices = @transform_3, window_bounds = array<i64: 128, 128>}, {pipeline_mode = #tpu.pipeline_mode<synchronous>, transform_indices = @transform_4, window_bounds = array<i64: 128, 128>}, {pipeline_mode = #tpu.pipeline_mode<synchronous>, transform_indices = @transform_5, window_bounds = array<i64: 1, 128>}, {pipeline_mode = #tpu.pipeline_mode<synchronous>, transform_indices = @transform_6, window_bounds = array<i64: 1, 128>}, {transform_indices = @transform_7, window_bounds = array<i64: 128, 128>}]} {
    %c0 = arith.constant 0 : index
    %c0_0 = arith.constant 0 : index
    %0 = vector.load %arg1[%c0, %c0_0] : memref<128x128xbf16, #tpu.memory_space<vmem>>, vector<128x128xbf16>
    %1 = arith.extf %0 : vector<128x128xbf16> to vector<128x128xf32>
    %c0_1 = arith.constant 0 : index
    %c0_2 = arith.constant 0 : index
    %2 = vector.load %arg2[%c0_1, %c0_2] : memref<1x128xf32, #tpu.memory_space<vmem>>, vector<1x128xf32>
    %3 = vector.broadcast %2 : vector<1x128xf32> to vector<128x128xf32>
    %4 = arith.mulf %1, %3 : vector<128x128xf32>
    %c0_3 = arith.constant 0 : index
    %c0_4 = arith.constant 0 : index
    %5 = vector.load %arg3[%c0_3, %c0_4] : memref<1x128xf32, #tpu.memory_space<vmem>>, vector<1x128xf32>
    %6 = vector.broadcast %5 : vector<1x128xf32> to vector<128x128xf32>
    %7 = arith.addf %4, %6 : vector<128x128xf32>
    %c0_5 = arith.constant 0 : index
    %c0_6 = arith.constant 0 : index
    %8 = vector.load %arg4[%c0_5, %c0_6] : memref<128x128xbf16, #tpu.memory_space<vmem>>, vector<128x128xbf16>
    %c0_7 = arith.constant 0 : index
    %c0_8 = arith.constant 0 : index
    %9 = vector.load %arg5[%c0_7, %c0_8] : memref<128x128xbf16, #tpu.memory_space<vmem>>, vector<128x128xbf16>
    %cst = arith.constant dense<0.000000e+00> : vector<128x128xf32>
    %10 = tpu.matmul %8, %9, %cst {dimension_numbers = #tpu.dot_dimension_numbers<[1], [0], [0], [1], [0, 0, 1, 1], [], []>} : vector<128x128xbf16>, vector<128x128xbf16>, vector<128x128xf32> -> vector<128x128xf32>
    %c0_9 = arith.constant 0 : index
    %c0_10 = arith.constant 0 : index
    %11 = vector.load %arg6[%c0_9, %c0_10] : memref<1x128xf32, #tpu.memory_space<vmem>>, vector<1x128xf32>
    %12 = vector.broadcast %11 : vector<1x128xf32> to vector<128x128xf32>
    %13 = arith.mulf %10, %12 : vector<128x128xf32>
    %14 = arith.addf %7, %13 : vector<128x128xf32>
    %c0_11 = arith.constant 0 : index
    %c0_12 = arith.constant 0 : index
    %15 = vector.load %arg7[%c0_11, %c0_12] : memref<1x128xf32, #tpu.memory_space<vmem>>, vector<1x128xf32>
    %16 = vector.broadcast %15 : vector<1x128xf32> to vector<128x128xf32>
    %17 = arith.addf %14, %16 : vector<128x128xf32>
    %cst_13 = arith.constant 0.000000e+00 : f32
    %18 = vector.broadcast %cst_13 : f32 to vector<128x128xf32>
    %19 = arith.maximumf %17, %18 : vector<128x128xf32>
    %c0_14 = arith.constant 0 : index
    %c0_15 = arith.constant 0 : index
    %20 = vector.load %arg8[%c0_14, %c0_15] : memref<128x128xf32, #tpu.memory_space<vmem>>, vector<128x128xf32>
    tpu.vector_store %arg8[%c0_14, %c0_15], %19 {strides = array<i32>} : memref<128x128xf32, #tpu.memory_space<vmem>>, vector<128x128xf32>,
    return
  }
  func.func @transform_0(%arg0: i32) -> (i32, i32) {
    %c0_i32 = arith.constant 0 : i32
    %c0_i32_0 = arith.constant 0 : i32
    return %arg0, %c0_i32 : i32, i32
  }
  func.func @transform_1(%arg0: i32) -> (i32, i32) {
    %c0_i32 = arith.constant 0 : i32
    %c0_i32_0 = arith.constant 0 : i32
    %c0_i32_1 = arith.constant 0 : i32
    return %c0_i32, %c0_i32_0 : i32, i32
  }
  func.func @transform_2(%arg0: i32) -> (i32, i32) {
    %c0_i32 = arith.constant 0 : i32
    %c0_i32_0 = arith.constant 0 : i32
    %c0_i32_1 = arith.constant 0 : i32
    return %c0_i32, %c0_i32_0 : i32, i32
  }
  func.func @transform_3(%arg0: i32) -> (i32, i32) {
    %c0_i32 = arith.constant 0 : i32
    %c0_i32_0 = arith.constant 0 : i32
    return %arg0, %c0_i32 : i32, i32
  }
  func.func @transform_4(%arg0: i32) -> (i32, i32) {
    %c0_i32 = arith.constant 0 : i32
    %c0_i32_0 = arith.constant 0 : i32
    %c0_i32_1 = arith.constant 0 : i32
    return %c0_i32, %c0_i32_0 : i32, i32
  }
  func.func @transform_5(%arg0: i32) -> (i32, i32) {
    %c0_i32 = arith.constant 0 : i32
    %c0_i32_0 = arith.constant 0 : i32
    %c0_i32_1 = arith.constant 0 : i32
    return %c0_i32, %c0_i32_0 : i32, i32
  }
  func.func @transform_6(%arg0: i32) -> (i32, i32) {
    %c0_i32 = arith.constant 0 : i32
    %c0_i32_0 = arith.constant 0 : i32
    %c0_i32_1 = arith.constant 0 : i32
    return %c0_i32, %c0_i32_0 : i32, i32
  }
  func.func @transform_7(%arg0: i32) -> (i32, i32) {
    %c0_i32 = arith.constant 0 : i32
    %c0_i32_0 = arith.constant 0 : i32
    return %arg0, %c0_i32 : i32, i32
  }
}

</mosaic_0001>

<bundles_post_ra>
// kernel: encoder_block_forward.6
= control target key start
LH: loop header
LB: loop body
LE: loop exit
PB: predicated region body
PF: predicated region fallthrough
CT: control target
= control target key end

     0   :  { %s422_s0 = inlined_call_operand.vmem [shape: bf16[128,128], index: 0, kind: input, shape index: {}]   ;;  %s423_s1 = inlined_call_operand.vmem [shape: f32[1,128], index: 1, kind: input, shape index: {}]   ;;  %s424_s2 = inlined_call_operand.vmem [shape: f32[1,128], index: 2, kind: input, shape index: {}]   ;;  %s425_s3 = inlined_call_operand.vmem [shape: bf16[128,128], index: 3, kind: output, shape index: {}]  }
   0x1   :  { %v227_v0 = vld [vmem:[%s422_s0] sm:$0xff]   ;;  %v298_v4 = vld [vmem:[%s422_s0 + $0x8] sm:$0xff]   ;;  %v299_v5 = vld [vmem:[%s422_s0 + $0x10] sm:$0xff]  }
   0x2   :  { %v338_v1 = vld [vmem:[%s423_s1] ss:$0 sm:$0xff]  ;;  %v228_v2 = vunpack.c.l.bf16 %v227_v0  ;;  %v229_v3 = vunpack.c.h.bf16 %v227_v0  ;;  %v300_v6 = vld [vmem:[%s422_s0 + $0x18] sm:$0xff]   ;;  %v232_v8 = vunpack.c.l.bf16 %v298_v4  ;;  %v233_v9 = vunpack.c.h.bf16 %v298_v4  ;;  %v302_v33 = vld [vmem:[%s422_s0 + $0x28] sm:$0xff]  }
   0x3   :  { %v352_v7 = vld [vmem:[%s424_s2] ss:$0 sm:$0xff]  ;;  %v236_v10 = vunpack.c.l.bf16 %v299_v5  ;;  %v237_v11 = vunpack.c.h.bf16 %v299_v5  ;;  %v240_v14 = vunpack.c.l.bf16 %v300_v6  ;;  %v241_v15 = vunpack.c.h.bf16 %v300_v6  ;;  %v303_v38 = vld [vmem:[%s422_s0 + $0x30] sm:$0xff]   ;;  %v304_v43 = vld [vmem:[%s422_s0 + $0x38] sm:$0xff]  }
   0x4   :  { %v53_v12 = vmul.f32 %v228_v2, %v338_v1  ;;  %v54_v13 = vmul.f32 %v229_v3, %v338_v1  ;;  %v55_v16 = vmul.f32 %v232_v8, %v338_v1  ;;  %v56_v17 = vmul.f32 %v233_v9, %v338_v1  ;;  %v301_v28 = vld [vmem:[%s422_s0 + $0x20] sm:$0xff]  }
   0x5   :  { %v57_v18 = vmul.f32 %v236_v10, %v338_v1  ;;  %v58_v19 = vmul.f32 %v237_v11, %v338_v1  ;;  %v59_v22 = vmul.f32 %v240_v14, %v338_v1  ;;  %v60_v23 = vmul.f32 %v241_v15, %v338_v1 }
   0x6   :  { %v76_v20 = vadd.f32 %v352_v7, %v53_v12  ;;  %v77_v21 = vadd.f32 %v352_v7, %v54_v13  ;;  %v78_v24 = vadd.f32 %v352_v7, %v55_v16  ;;  %v79_v25 = vadd.f32 %v352_v7, %v56_v17 }
   0x7   :  { %v80_v26 = vadd.f32 %v352_v7, %v57_v18  ;;  %v81_v27 = vadd.f32 %v352_v7, %v58_v19  ;;  %v82_v31 = vadd.f32 %v352_v7, %v59_v22  ;;  %v83_v32 = vadd.f32 %v352_v7, %v60_v23 }
   0x8   :  { %v92_v29 = vmax.f32 %v76_v20, 0.0  ;;  %v93_v30 = vmax.f32 %v77_v21, 0.0  ;;  %v94_v34 = vmax.f32 %v78_v24, 0.0  ;;  %v95_v35 = vmax.f32 %v79_v25, 0.0 }
   0x9   :  { %v96_v36 = vmax.f32 %v80_v26, 0.0  ;;  %v97_v37 = vmax.f32 %v81_v27, 0.0  ;;  %v98_v40 = vmax.f32 %v82_v31, 0.0  ;;  %v99_v41 = vmax.f32 %v83_v32, 0.0 }
   0xa   :  { %v261_v39 = vpack.c.bf16 %v93_v30, %v92_v29  ;;  %v244_v42 = vunpack.c.l.bf16 %v301_v28  ;;  %v266_v44 = vpack.c.bf16 %v95_v35, %v94_v34  ;;  %v245_v46 = vunpack.c.h.bf16 %v301_v28 }
   0xb   :  { %v271_v45 = vpack.c.bf16 %v97_v37, %v96_v36  ;;  %v248_v47 = vunpack.c.l.bf16 %v302_v33  ;;  %v276_v48 = vpack.c.bf16 %v99_v41, %v98_v40  ;;  %v249_v50 = vunpack.c.h.bf16 %v302_v33 }
   0xc   :  { %262 = vst [vmem:[%s425_s3] sm:$0xff] %v261_v39   ;;  %v61_v49 = vmul.f32 %v244_v42, %v338_v1  ;;  %v252_v51 = vunpack.c.l.bf16 %v303_v38  ;;  %305 = vst [vmem:[%s425_s3 + $0x8] sm:$0xff] %v266_v44   ;;  %v62_v52 = vmul.f32 %v245_v46, %v338_v1  ;;  %v253_v54 = vunpack.c.h.bf16 %v303_v38 }
   0xd   :  { %306 = vst [vmem:[%s425_s3 + $0x10] sm:$0xff] %v271_v45   ;;  %v63_v53 = vmul.f32 %v248_v47, %v338_v1  ;;  %v256_v55 = vunpack.c.l.bf16 %v304_v43  ;;  %307 = vst [vmem:[%s425_s3 + $0x18] sm:$0xff] %v276_v48   ;;  %v64_v57 = vmul.f32 %v249_v50, %v338_v1  ;;  %v257_v59 = vunpack.c.h.bf16 %v304_v43 }
   0xe   :  { %v84_v56 = vadd.f32 %v352_v7, %v61_v49  ;;  %v65_v58 = vmul.f32 %v252_v51, %v338_v1  ;;  %v85_v60 = vadd.f32 %v352_v7, %v62_v52  ;;  %v66_v62 = vmul.f32 %v253_v54, %v338_v1 }
   0xf   :  { %v86_v61 = vadd.f32 %v352_v7, %v63_v53  ;;  %v67_v63 = vmul.f32 %v256_v55, %v338_v1  ;;  %v87_v2 = vadd.f32 %v352_v7, %v64_v57  ;;  %v68_v4 = vmul.f32 %v257_v59, %v338_v1 }
  0x10   :  { %v100_v0 = vmax.f32 %v84_v56, 0.0  ;;  %v88_v3 = vadd.f32 %v352_v7, %v65_v58  ;;  %v101_v5 = vmax.f32 %v85_v60, 0.0  ;;  %v89_v8 = vadd.f32 %v352_v7, %v66_v62 }
  0x11   :  { %v102_v6 = vmax.f32 %v86_v61, 0.0  ;;  %v90_v9 = vadd.f32 %v352_v7, %v67_v63  ;;  %v103_v10 = vmax.f32 %v87_v2, 0.0  ;;  %v91_v12 = vadd.f32 %v352_v7, %v68_v4 }
  0x12   :  { %v104_v11 = vmax.f32 %v88_v3, 0.0  ;;  %v281_v13 = vpack.c.bf16 %v101_v5, %v100_v0  ;;  %v105_v14 = vmax.f32 %v89_v8, 0.0 }
  0x13   :  { %v106_v15 = vmax.f32 %v90_v9, 0.0  ;;  %v286_v16 = vpack.c.bf16 %v103_v10, %v102_v6  ;;  %v107_v17 = vmax.f32 %v91_v12, 0.0 }
  0x14   :  { %308 = vst [vmem:[%s425_s3 + $0x20] sm:$0xff] %v281_v13   ;;  %v291_v1 = vpack.c.bf16 %v105_v14, %v104_v11 }
  0x15   :  { %309 = vst [vmem:[%s425_s3 + $0x28] sm:$0xff] %v286_v16   ;;  %v296_v18 = vpack.c.bf16 %v107_v17, %v106_v15 }
  0x16   :  { %310 = vst [vmem:[%s425_s3 + $0x30] sm:$0xff] %v291_v1  }
  0x17   :  { %311 = vst [vmem:[%s425_s3 + $0x38] sm:$0xff] %v296_v18  }

// kernel: encoder_block_forward.5
= control target key start
LH: loop header
LB: loop body
LE: loop exit
PB: predicated region body
PF: predicated region fallthrough
CT: control target
= control target key end

     0   :  { %vm1661_vm0 = vcmask 1040384   ;;  %s2966_s1 = inlined_call_operand.vmem [shape: bf16[1152,128], index: 1, kind: input, shape index: {}]   ;;  %s2967_s0 = inlined_call_operand.vmem [shape: bf16[128,1152], index: 0, kind: input, shape index: {}]   ;;  %s2968_s2 = inlined_call_operand.vmem [shape: bf16[128,128], index: 2, kind: output, shape index: {0}]   ;;  %s2969_s3 = inlined_call_operand.vmem [shape: f32[1,2,128], index: 3, kind: output, shape index: {1}]  }
   0x1   :  { %v2215_v0 = vld [vmem:[%s2966_s1 + $0x40] sm:$0xff]   ;;  %v2219_v4 = vld [vmem:[%s2966_s1 + $0x48] sm:$0xff]   ;;  %v2223_v8 = vld [vmem:[%s2966_s1 + $0x50] sm:$0xff]  }
   0x2   :  { %v2216_v1 = vld [vmem:[%s2966_s1 + $0xc0] sm:$0xff]   ;;  %1895 = vmatprep.subr.bf16.mxu0 %v2215_v0  ;;  %v2220_v5 = vld [vmem:[%s2966_s1 + $0xc8] sm:$0xff]   ;;  %v2224_v9 = vld [vmem:[%s2966_s1 + $0xd0] sm:$0xff]  }
   0x3   :  { %v2217_v2 = vld [vmem:[%s2966_s1] sm:$0xff]   ;;  %1959 = vmatprep.subr.bf16.mxu1 %v2216_v1  ;;  %v2221_v6 = vld [vmem:[%s2966_s1 + $0x8] sm:$0xff]   ;;  %v2225_v10 = vld [vmem:[%s2966_s1 + $0x10] sm:$0xff]  }
   0x4   :  { %v2218_v3 = vld [vmem:[%s2966_s1 + $0x80] sm:$0xff]   ;;  %1896 = vmatpush3.bf16.msra.mxu0 %v2217_v2  ;;  %v2222_v7 = vld [vmem:[%s2966_s1 + $0x88] sm:$0xff]   ;;  %v2226_v11 = vld [vmem:[%s2966_s1 + $0x90] sm:$0xff]  }
   0x5   :  { %1960 = vmatpush3.bf16.msra.mxu1 %v2218_v3  ;;  %1897 = vmatprep.subr.bf16.mxu0 %v2219_v4  ;;  %v2227_v12 = vld [vmem:[%s2966_s1 + $0x58] sm:$0xff]   ;;  %v2231_v16 = vld [vmem:[%s2966_s1 + $0x60] sm:$0xff]   ;;  %v2235_v20 = vld [vmem:[%s2966_s1 + $0x68] sm:$0xff]  }
   0x6   :  { %1961 = vmatprep.subr.bf16.mxu1 %v2220_v5  ;;  %v2228_v13 = vld [vmem:[%s2966_s1 + $0xd8] sm:$0xff]   ;;  %v2232_v17 = vld [vmem:[%s2966_s1 + $0xe0] sm:$0xff]   ;;  %v2236_v21 = vld [vmem:[%s2966_s1 + $0xe8] sm:$0xff]  }
   0x7   :  { %v2229_v14 = vld [vmem:[%s2966_s1 + $0x18] sm:$0xff]   ;;  %v2233_v18 = vld [vmem:[%s2966_s1 + $0x20] sm:$0xff]   ;;  %v2237_v22 = vld [vmem:[%s2966_s1 + $0x28] sm:$0xff]  }
   0x8   :  { %1898 = vmatpush3.bf16.msra.mxu0 %v2221_v6  ;;  %v2230_v15 = vld [vmem:[%s2966_s1 + $0x98] sm:$0xff]   ;;  %v2234_v19 = vld [vmem:[%s2966_s1 + $0xa0] sm:$0xff]   ;;  %v2238_v23 = vld [vmem:[%s2966_s1 + $0xa8] sm:$0xff]  }
   0x9   :  { %1962 = vmatpush3.bf16.msra.mxu1 %v2222_v7  ;;  %1899 = vmatprep.subr.bf16.mxu0 %v2223_v8  ;;  %v2239_v24 = vld [vmem:[%s2966_s1 + $0x70] sm:$0xff]   ;;  %v2243_v28 = vld [vmem:[%s2966_s1 + $0x78] sm:$0xff]   ;;  %v2247_v32 = vld [vmem:[%s2967_s0] ss:$36 sps:$4 sm:$0xff]  }
   0xa   :  { %1963 = vmatprep.subr.bf16.mxu1 %v2224_v9  ;;  %v2240_v25 = vld [vmem:[%s2966_s1 + $0xf0] sm:$0xff]   ;;  %v2244_v29 = vld [vmem:[%s2966_s1 + $0xf8] sm:$0xff]   ;;  %v2249_v33 = vld [vmem:[%s2967_s0 + $0x4] ss:$36 sps:$4 sm:$0xff]  }
   0xb   :  { %v2241_v26 = vld [vmem:[%s2966_s1 + $0x30] sm:$0xff]   ;;  %v2245_v30 = vld [vmem:[%s2966_s1 + $0x38] sm:$0xff]   ;;  %v2250_v34 = vld [vmem:[%s2967_s0 + $0x8] ss:$36 sps:$4 sm:$0xff]   ;;  %1070 = vmatprep.mubr.bf16.mxu0 %v2249_v33 }
   0xc   :  { %1900 = vmatpush3.bf16.msra.mxu0 %v2225_v10  ;;  %v2242_v27 = vld [vmem:[%s2966_s1 + $0xb0] sm:$0xff]   ;;  %v2246_v31 = vld [vmem:[%s2966_s1 + $0xb8] sm:$0xff]   ;;  %v2253_v36 = vld [vmem:[%s2966_s1 + $0x140] sm:$0xff]  }
   0xd   :  { %1964 = vmatpush3.bf16.msra.mxu1 %v2226_v11  ;;  %1901 = vmatprep.subr.bf16.mxu0 %v2227_v12  ;;  %v2252_v35 = vld [vmem:[%s2967_s0 + $0xc] ss:$36 sps:$4 sm:$0xff]   ;;  %v2254_v37 = vld [vmem:[%s2966_s1 + $0x100] sm:$0xff]   ;;  %v2257_v39 = vld [vmem:[%s2967_s0 + $0x54] ss:$36 sps:$4 sm:$0xff]  }
   0xe   :  { %1965 = vmatprep.subr.bf16.mxu1 %v2228_v13  ;;  %1167 = vmatprep.mubr.bf16.mxu1 %v2252_v35  ;;  %v2255_v38 = vld [vmem:[%s2967_s0 + $0x4c] ss:$36 sps:$4 sm:$0xff]   ;;  %v2263_v44 = vld [vmem:[%s2967_s0 + $0x94] ss:$36 sps:$4 sm:$0xff]   ;;  %v2265_v45 = vld [vmem:[%s2967_s0 + $0x9c] ss:$36 sps:$4 sm:$0xff]  }
   0xf   :  { %v2259_v40 = vld [vmem:[%s2967_s0 + $0x48] ss:$36 sps:$4 sm:$0xff]   ;;  %v2260_v41 = vld [vmem:[%s2967_s0 + $0x50] ss:$36 sps:$4 sm:$0xff]   ;;  %v2270_v47 = vld [vmem:[%s2966_s1 + $0x1c0] sm:$0xff]  }
  0x10   :  { %1902 = vmatpush3.bf16.msra.mxu0 %v2229_v14  ;;  %v2261_v42 = vld [vmem:[%s2966_s1 + $0x148] sm:$0xff]   ;;  %v2269_v46 = vld [vmem:[%s2966_s1 + $0x150] sm:$0xff]   ;;  %v2272_v50 = vld [vmem:[%s2966_s1 + $0x180] sm:$0xff]  }
  0x11   :  { %1966 = vmatpush3.bf16.msra.mxu1 %v2230_v15  ;;  %1903 = vmatprep.subr.bf16.mxu0 %v2231_v16  ;;  %v2262_v43 = vld [vmem:[%s2966_s1 + $0x108] sm:$0xff]   ;;  %v2267_v48 = vld [vmem:[%s2967_s0 + $0x90] ss:$36 sps:$4 sm:$0xff]   ;;  %v2268_v51 = vld [vmem:[%s2967_s0 + $0x98] ss:$36 sps:$4 sm:$0xff]  }
  0x12   :  { %1967 = vmatprep.subr.bf16.mxu1 %v2232_v17  ;;  %v2271_v49 = vld [vmem:[%s2966_s1 + $0x110] sm:$0xff]   ;;  %v2273_v52 = vld [vmem:[%s2967_s0 + $0xdc] ss:$36 sps:$4 sm:$0xff]   ;;  %v2275_v53 = vld [vmem:[%s2967_s0 + $0xe4] ss:$36 sps:$4 sm:$0xff]  }
  0x13   :  { %v2279_v54 = vld [vmem:[%s2966_s1 + $0x158] sm:$0xff]   ;;  %v2280_v55 = vld [vmem:[%s2966_s1 + $0x1c8] sm:$0xff]   ;;  %v2278_v59 = vld [vmem:[%s2967_s0 + $0xe0] ss:$36 sps:$4 sm:$0xff]  }
  0x14   :  { %1904 = vmatpush3.bf16.msra.mxu0 %v2233_v18  ;;  %v2281_v56 = vld [vmem:[%s2966_s1 + $0x118] sm:$0xff]   ;;  %v2282_v57 = vld [vmem:[%s2966_s1 + $0x188] sm:$0xff]   ;;  %v2289_v62 = vld [vmem:[%s2966_s1 + $0x160] sm:$0xff]  }
  0x15   :  { %1968 = vmatpush3.bf16.msra.mxu1 %v2234_v19  ;;  %1905 = vmatprep.subr.bf16.mxu0 %v2235_v20  ;;  %v2277_v58 = vld [vmem:[%s2967_s0 + $0xd8] ss:$36 sps:$4 sm:$0xff]   ;;  %v2283_v60 = vld [vmem:[%s2967_s0 + $0x124] ss:$36 sps:$4 sm:$0xff]   ;;  %v2285_v61 = vld [vmem:[%s2967_s0 + $0x12c] ss:$36 sps:$4 sm:$0xff]  }
  0x16   :  { %1969 = vmatprep.subr.bf16.mxu1 %v2236_v21  ;;  %v2290_v63 = vld [vmem:[%s2966_s1 + $0x1d0] sm:$0xff]   ;;  %v2291_v0 = vld [vmem:[%s2966_s1 + $0x120] sm:$0xff]   ;;  %v2288_v3 = vld [vmem:[%s2967_s0 + $0x128] ss:$36 sps:$4 sm:$0xff]  }
  0x17   :  { %v2292_v1 = vld [vmem:[%s2966_s1 + $0x190] sm:$0xff]   ;;  %v2287_v2 = vld [vmem:[%s2967_s0 + $0x120] ss:$36 sps:$4 sm:$0xff]   ;;  %v2299_v6 = vld [vmem:[%s2966_s1 + $0x168] sm:$0xff]  }
  0x18   :  { %1906 = vmatpush3.bf16.msra.mxu0 %v2237_v22  ;;  %v2293_v4 = vld [vmem:[%s2967_s0 + $0x16c] ss:$36 sps:$4 sm:$0xff]   ;;  %v2295_v5 = vld [vmem:[%s2967_s0 + $0x174] ss:$36 sps:$4 sm:$0xff]   ;;  %v2305_v14 = vld [vmem:[%s2967_s0 + $0x1bc] ss:$36 sps:$4 sm:$0xff]  }
  0x19   :  { %1970 = vmatpush3.bf16.msra.mxu1 %v2238_v23  ;;  %1907 = vmatprep.subr.bf16.mxu0 %v2239_v24  ;;  %v2300_v7 = vld [vmem:[%s2966_s1 + $0x1d8] sm:$0xff]   ;;  %v2301_v8 = vld [vmem:[%s2966_s1 + $0x128] sm:$0xff]   ;;  %v2298_v11 = vld [vmem:[%s2967_s0 + $0x170] ss:$36 sps:$4 sm:$0xff]  }
  0x1a   :  { %1971 = vmatprep.subr.bf16.mxu1 %v2240_v25  ;;  %v2302_v9 = vld [vmem:[%s2966_s1 + $0x198] sm:$0xff]   ;;  %v2297_v10 = vld [vmem:[%s2967_s0 + $0x168] ss:$36 sps:$4 sm:$0xff]   ;;  %v2309_v13 = vld [vmem:[%s2966_s1 + $0x170] sm:$0xff]  }
  0x1b   :  { %v2303_v12 = vld [vmem:[%s2967_s0 + $0x1b4] ss:$36 sps:$4 sm:$0xff]   ;;  %v2310_v15 = vld [vmem:[%s2966_s1 + $0x1e0] sm:$0xff]   ;;  %v2313_v18 = vld [vmem:[%s2966_s1 + $0x1e8] sm:$0xff]  }
  0x1c   :  { %1908 = vmatpush3.bf16.msra.mxu0 %v2241_v26  ;;  %v2311_v16 = vld [vmem:[%s2966_s1 + $0x130] sm:$0xff]   ;;  %v2312_v17 = vld [vmem:[%s2966_s1 + $0x1a0] sm:$0xff]   ;;  %v2314_v19 = vld [vmem:[%s2966_s1 + $0x1a8] sm:$0xff]  }
  0x1d   :  { %1972 = vmatpush3.bf16.msra.mxu1 %v2242_v27  ;;  %1909 = vmatprep.subr.bf16.mxu0 %v2243_v28  ;;  %v2307_v20 = vld [vmem:[%s2967_s0 + $0x1b0] ss:$36 sps:$4 sm:$0xff]   ;;  %v2308_v21 = vld [vmem:[%s2967_s0 + $0x1b8] ss:$36 sps:$4 sm:$0xff]   ;;  %v2317_v23 = vld [vmem:[%s2967_s0 + $0x204] ss:$36 sps:$4 sm:$0xff]  }
  0x1e   :  { %1973 = vmatprep.subr.bf16.mxu1 %v2244_v29  ;;  %v2315_v22 = vld [vmem:[%s2967_s0 + $0x1fc] ss:$36 sps:$4 sm:$0xff]   ;;  %v2322_v25 = vld [vmem:[%s2966_s1 + $0x1f0] sm:$0xff]  }
  0x1f   :  { %v2321_v24 = vld [vmem:[%s2966_s1 + $0x178] sm:$0xff]   ;;  %v2324_v27 = vld [vmem:[%s2966_s1 + $0x1b0] sm:$0xff]  }
  0x20   :  { %1910 = vmatpush3.bf16.msra.mxu0 %v2245_v30  ;;  %v2323_v26 = vld [vmem:[%s2966_s1 + $0x138] sm:$0xff]   ;;  %v2320_v30 = vld [vmem:[%s2967_s0 + $0x200] ss:$36 sps:$4 sm:$0xff]   ;;  %v2327_v35 = vld [vmem:[%s2967_s0 + $0x10] ss:$36 sps:$4 sm:$0xff]  }
  0x21   :  { %1974 = vmatpush3.bf16.msra.mxu1 %v2246_v31  ;;  %2023 = vmatprep.subr.bf16.mxu0 %v2253_v36  ;;  %v2325_v28 = vld [vmem:[%s2966_s1 + $0x1f8] sm:$0xff]  }
  0x22   :  { %2087 = vmatprep.subr.bf16.mxu1 %v2270_v47  ;;  %v2319_v29 = vld [vmem:[%s2967_s0 + $0x1f8] ss:$36 sps:$4 sm:$0xff]   ;;  %v2345_v47 = vld [vmem:[%s2967_s0 + $0xa0] ss:$36 sps:$4 sm:$0xff]  }
  0x23   :  { %1071 = vmatmul.mubr.bf16.vlgmr.msra.gmra.mrb[0].mxu0 %v2247_v32  ;;  %v2326_v31 = vld [vmem:[%s2966_s1 + $0x1b8] sm:$0xff]   ;;  %v2333_v32 = vld [vmem:[%s2966_s1 + $0x200] sm:$0xff]  }
  0x24   :  { %1168 = vmatmul.mubr.bf16.vlgmr.msra.gmra.mrb[0].mxu1 %v2250_v34  ;;  %2024 = vmatpush3.bf16.msra.mxu0 %v2254_v37  ;;  %v2329_v33 = vld [vmem:[%s2967_s0 + $0x14] ss:$36 sps:$4 sm:$0xff]   ;;  %v2332_v34 = vld [vmem:[%s2967_s0 + $0x1c] ss:$36 sps:$4 sm:$0xff]  }
  0x25   :  { %1078 = vmatprep.mubr.bf16.mxu0 %v2255_v38  ;;  %1175 = vmatprep.mubr.bf16.mxu1 %v2257_v39  ;;  %v2330_v36 = vld [vmem:[%s2967_s0 + $0x18] ss:$36 sps:$4 sm:$0xff]   ;;  %v2336_v38 = vld [vmem:[%s2967_s0 + $0x64] ss:$36 sps:$4 sm:$0xff]  }
  0x26   :  { %2025 = vmatprep.subr.bf16.mxu0 %v2261_v42  ;;  %2088 = vmatpush3.bf16.msra.mxu1 %v2272_v50  ;;  %v2334_v37 = vld [vmem:[%s2967_s0 + $0x5c] ss:$36 sps:$4 sm:$0xff]   ;;  %v2340_v39 = vld [vmem:[%s2966_s1 + $0x208] sm:$0xff]   ;;  %v2350_v50 = vld [vmem:[%s2967_s0 + $0xf4] ss:$36 sps:$4 sm:$0xff]  }
  0x27   :  { %2089 = vmatprep.subr.bf16.mxu1 %v2280_v55  ;;  %v2339_v42 = vld [vmem:[%s2967_s0 + $0x60] ss:$36 sps:$4 sm:$0xff]   ;;  %v2355_v55 = vld [vmem:[%s2967_s0 + $0x134] ss:$36 sps:$4 sm:$0xff]  }
  0x28   :  { %2026 = vmatpush3.bf16.msra.mxu0 %v2262_v43  ;;  %v2341_v43 = vld [vmem:[%s2967_s0 + $0xa4] ss:$36 sps:$4 sm:$0xff]  }
  0x29   :  { %2027 = vmatprep.subr.bf16.mxu0 %v2269_v46  ;;  %v2361_v46 = vld [vmem:[%s2966_s1 + $0x220] sm:$0xff]  }
  0x2a   :  { %2090 = vmatpush3.bf16.msra.mxu1 %v2282_v57  ;;  %v2382_v57 = vld [vmem:[%s2966_s1 + $0x238] sm:$0xff]  }
  0x2b   :  { %1079 = vmatmul.mubr.bf16.gmra.mrb[4].mxu0 %v2259_v40  ;;  %2091 = vmatprep.subr.bf16.mxu1 %v2290_v63  ;;  %v2347_v40 = vld [vmem:[%s2966_s1 + $0x210] sm:$0xff]   ;;  %v2367_v63 = vld [vmem:[%s2967_s0 + $0x180] ss:$36 sps:$4 sm:$0xff]  }
  0x2c   :  { %1176 = vmatmul.mubr.bf16.gmra.mrb[4].mxu1 %v2260_v41  ;;  %1086 = vmatprep.mubr.bf16.mxu0 %v2263_v44  ;;  %v2338_v41 = vld [vmem:[%s2967_s0 + $0x58] ss:$36 sps:$4 sm:$0xff]   ;;  %v2343_v44 = vld [vmem:[%s2967_s0 + $0xac] ss:$36 sps:$4 sm:$0xff]  }
  0x2d   :  { %1183 = vmatprep.mubr.bf16.mxu1 %v2265_v45  ;;  %2028 = vmatpush3.bf16.msra.mxu0 %v2271_v49  ;;  %v2354_v45 = vld [vmem:[%s2966_s1 + $0x218] sm:$0xff]   ;;  %v2348_v49 = vld [vmem:[%s2967_s0 + $0xec] ss:$36 sps:$4 sm:$0xff]  }
  0x2e   :  { %2029 = vmatprep.subr.bf16.mxu0 %v2279_v54  ;;  %2092 = vmatpush3.bf16.msra.mxu1 %v2292_v1  ;;  %v2353_v54 = vld [vmem:[%s2967_s0 + $0xf0] ss:$36 sps:$4 sm:$0xff]  }
  0x2f   :  { %2093 = vmatprep.subr.bf16.mxu1 %v2300_v7  ;;  %v2371_v1 = vld [vmem:[%s2967_s0 + $0x1cc] ss:$36 sps:$4 sm:$0xff]  }
  0x30   :  { %v2381_v7 = vld [vmem:[%s2967_s0 + $0x210] ss:$36 sps:$4 sm:$0xff]  }
  0x31   :  { %2030 = vmatpush3.bf16.msra.mxu0 %v2281_v56  ;;  %v2357_v56 = vld [vmem:[%s2967_s0 + $0x13c] ss:$36 sps:$4 sm:$0xff]  }
  0x32   :  { %2031 = vmatprep.subr.bf16.mxu0 %v2289_v62  ;;  %2094 = vmatpush3.bf16.msra.mxu1 %v2302_v9  ;;  %v2366_v62 = vld [vmem:[%s2967_s0 + $0x178] ss:$36 sps:$4 sm:$0xff]   ;;  %v2384_v9 = vld [vmem:[%s2967_s0 + $0x140] ss:$36 sps:$4 sm:$0xff]  }
  0x33   :  { %1087 = vmatmul.mubr.bf16.gmra.mrb[8].mxu0 %v2267_v48  ;;  %2095 = vmatprep.subr.bf16.mxu1 %v2310_v15  ;;  %v2346_v48 = vld [vmem:[%s2967_s0 + $0xa8] ss:$36 sps:$4 sm:$0xff]   ;;  %v2390_v15 = vld [vmem:[%s2967_s0 + $0x218] ss:$36 sps:$4 sm:$0xff]  }
  0x34   :  { %1184 = vmatmul.mubr.bf16.gmra.mrb[8].mxu1 %v2268_v51  ;;  %1094 = vmatprep.mubr.bf16.mxu0 %v2273_v52  ;;  %v2368_v51 = vld [vmem:[%s2966_s1 + $0x228] sm:$0xff]  }
  0x35   :  { %1191 = vmatprep.mubr.bf16.mxu1 %v2275_v53  ;;  %2032 = vmatpush3.bf16.msra.mxu0 %v2291_v0  ;;  %v2352_v52 = vld [vmem:[%s2967_s0 + $0xe8] ss:$36 sps:$4 sm:$0xff]   ;;  %v2375_v53 = vld [vmem:[%s2966_s1 + $0x230] sm:$0xff]  }
  0x36   :  { %2033 = vmatprep.subr.bf16.mxu0 %v2299_v6  ;;  %2096 = vmatpush3.bf16.msra.mxu1 %v2312_v17  ;;  %v2369_v0 = vld [vmem:[%s2967_s0 + $0x1c4] ss:$36 sps:$4 sm:$0xff]  }
  0x37   :  { %2097 = vmatprep.subr.bf16.mxu1 %v2313_v18  ;;  %v2380_v6 = vld [vmem:[%s2967_s0 + $0x208] ss:$36 sps:$4 sm:$0xff]  }
  0x39   :  { %2034 = vmatpush3.bf16.msra.mxu0 %v2301_v8  ;;  %v2383_v8 = vld [vmem:[%s2967_s0 + $0x20] ss:$36 sps:$4 sm:$0xff]  }
  0x3a   :  { %2035 = vmatprep.subr.bf16.mxu0 %v2309_v13  ;;  %2098 = vmatpush3.bf16.msra.mxu1 %v2314_v19  ;;  %v2388_v13 = vld [vmem:[%s2967_s0 + $0x1d0] ss:$36 sps:$4 sm:$0xff]  }
  0x3b   :  { %1095 = vmatmul.mubr.bf16.gmra.mrb[12].mxu0 %v2277_v58  ;;  %2099 = vmatprep.subr.bf16.mxu1 %v2322_v25  ;;  %v2359_v58 = vld [vmem:[%s2967_s0 + $0x130] ss:$36 sps:$4 sm:$0xff]  }
  0x3c   :  { %1192 = vmatmul.mubr.bf16.gmra.mrb[12].mxu1 %v2278_v59  ;;  %1102 = vmatprep.mubr.bf16.mxu0 %v2283_v60  ;;  %v2360_v59 = vld [vmem:[%s2967_s0 + $0x138] ss:$36 sps:$4 sm:$0xff]  }
  0x3d   :  { %1199 = vmatprep.mubr.bf16.mxu1 %v2285_v61  ;;  %2036 = vmatpush3.bf16.msra.mxu0 %v2311_v16  ;;  %v2362_v60 = vld [vmem:[%s2967_s0 + $0x17c] ss:$36 sps:$4 sm:$0xff]   ;;  %v2364_v61 = vld [vmem:[%s2967_s0 + $0x184] ss:$36 sps:$4 sm:$0xff]  }
  0x3e   :  { %2037 = vmatprep.subr.bf16.mxu0 %v2321_v24  ;;  %2100 = vmatpush3.bf16.msra.mxu1 %v2324_v27 }
  0x3f   :  { %2101 = vmatprep.subr.bf16.mxu1 %v2325_v28 }
  0x41   :  { %2038 = vmatpush3.bf16.msra.mxu0 %v2323_v26 }
  0x42   :  { %2167 = vmatprep.subr.bf16.mxu0 %v2333_v32  ;;  %2102 = vmatpush3.bf16.msra.mxu1 %v2326_v31 }
  0x43   :  { %1103 = vmatmul.mubr.bf16.gmra.mrb[16].mxu0 %v2287_v2  ;;  %2199 = vmatprep.subr.bf16.mxu1 %v2333_v32  ;;  %v2373_v2 = vld [vmem:[%s2967_s0 + $0x1c0] ss:$36 sps:$4 sm:$0xff]  }
  0x44   :  { %1200 = vmatmul.mubr.bf16.gmra.mrb[16].mxu1 %v2288_v3  ;;  %1110 = vmatprep.mubr.bf16.mxu0 %v2293_v4  ;;  %v2374_v3 = vld [vmem:[%s2967_s0 + $0x1c8] ss:$36 sps:$4 sm:$0xff]  }
  0x45   :  { %1207 = vmatprep.mubr.bf16.mxu1 %v2295_v5  ;;  %v2376_v4 = vld [vmem:[%s2967_s0 + $0x20c] ss:$36 sps:$4 sm:$0xff]   ;;  %v2378_v5 = vld [vmem:[%s2967_s0 + $0x214] ss:$36 sps:$4 sm:$0xff]  }
  0x4b   :  { %1111 = vmatmul.mubr.bf16.gmra.mrb[20].mxu0 %v2297_v10  ;;  %v2385_v10 = vld [vmem:[%s2967_s0 + $0x68] ss:$36 sps:$4 sm:$0xff]  }
  0x4c   :  { %1208 = vmatmul.mubr.bf16.gmra.mrb[20].mxu1 %v2298_v11  ;;  %1118 = vmatprep.mubr.bf16.mxu0 %v2303_v12  ;;  %v2386_v11 = vld [vmem:[%s2967_s0 + $0x188] ss:$36 sps:$4 sm:$0xff]   ;;  %v2387_v12 = vld [vmem:[%s2967_s0 + $0xb0] ss:$36 sps:$4 sm:$0xff]  }
  0x4d   :  { %1215 = vmatprep.mubr.bf16.mxu1 %v2305_v14  ;;  %v2389_v14 = vld [vmem:[%s2967_s0 + $0xf8] ss:$36 sps:$4 sm:$0xff]  }
  0x53   :  { %1119 = vmatmul.mubr.bf16.gmra.mrb[24].mxu0 %v2307_v20 }
  0x54   :  { %1216 = vmatmul.mubr.bf16.gmra.mrb[24].mxu1 %v2308_v21  ;;  %1126 = vmatprep.mubr.bf16.mxu0 %v2315_v22 }
  0x55   :  { %1223 = vmatprep.mubr.bf16.mxu1 %v2317_v23 }
  0x5b   :  { %1127 = vmatmul.mubr.bf16.gmra.mrb[28].mxu0 %v2319_v29 }
  0x5c   :  { %1224 = vmatmul.mubr.bf16.gmra.mrb[28].mxu1 %v2320_v30  ;;  %1264 = vmatprep.mubr.bf16.mxu0 %v2329_v33 }
  0x5d   :  { %1361 = vmatprep.mubr.bf16.mxu1 %v2332_v34 }
  0x63   :  { %1265 = vmatmul.mubr.bf16.vlgmr.msra.gmra.mrb[32].mxu0 %v2327_v35 }
  0x64   :  { %1362 = vmatmul.mubr.bf16.vlgmr.msra.gmra.mrb[32].mxu1 %v2330_v36  ;;  %2168 = vmatpush3.bf16.msra.mxu0 %v2333_v32 }
  0x65   :  { %1272 = vmatprep.mubr.bf16.mxu0 %v2334_v37  ;;  %1369 = vmatprep.mubr.bf16.mxu1 %v2336_v38 }
  0x66   :  { %2169 = vmatprep.subr.bf16.mxu0 %v2340_v39  ;;  %2207 = vmatpush3.bf16.msra.mxu1 %v2333_v32 }
  0x67   :  { %2200 = vmatprep.subr.bf16.mxu1 %v2340_v39 }
  0x68   :  { %2170 = vmatpush3.bf16.msra.mxu0 %v2340_v39 }
  0x69   :  { %2171 = vmatprep.subr.bf16.mxu0 %v2347_v40 }
  0x6a   :  { %2208 = vmatpush3.bf16.msra.mxu1 %v2340_v39 }
  0x6b   :  { %1273 = vmatmul.mubr.bf16.gmra.mrb[36].mxu0 %v2338_v41  ;;  %2201 = vmatprep.subr.bf16.mxu1 %v2347_v40 }
  0x6c   :  { %1370 = vmatmul.mubr.bf16.gmra.mrb[36].mxu1 %v2339_v42  ;;  %1280 = vmatprep.mubr.bf16.mxu0 %v2341_v43 }
  0x6d   :  { %1377 = vmatprep.mubr.bf16.mxu1 %v2343_v44  ;;  %2172 = vmatpush3.bf16.msra.mxu0 %v2347_v40 }
  0x6e   :  { %2173 = vmatprep.subr.bf16.mxu0 %v2354_v45  ;;  %2209 = vmatpush3.bf16.msra.mxu1 %v2347_v40 }
  0x6f   :  { %2202 = vmatprep.subr.bf16.mxu1 %v2354_v45 }
  0x71   :  { %2174 = vmatpush3.bf16.msra.mxu0 %v2354_v45 }
  0x72   :  { %2175 = vmatprep.subr.bf16.mxu0 %v2361_v46  ;;  %2210 = vmatpush3.bf16.msra.mxu1 %v2354_v45 }
  0x73   :  { %1281 = vmatmul.mubr.bf16.gmra.mrb[40].mxu0 %v2345_v47  ;;  %2203 = vmatprep.subr.bf16.mxu1 %v2361_v46 }
  0x74   :  { %1378 = vmatmul.mubr.bf16.gmra.mrb[40].mxu1 %v2346_v48  ;;  %1288 = vmatprep.mubr.bf16.mxu0 %v2348_v49 }
  0x75   :  { %1385 = vmatprep.mubr.bf16.mxu1 %v2350_v50  ;;  %2176 = vmatpush3.bf16.msra.mxu0 %v2361_v46 }
  0x76   :  { %2177 = vmatprep.subr.bf16.mxu0 %v2368_v51  ;;  %2211 = vmatpush3.bf16.msra.mxu1 %v2361_v46 }
  0x77   :  { %2204 = vmatprep.subr.bf16.mxu1 %v2368_v51 }
  0x79   :  { %2178 = vmatpush3.bf16.msra.mxu0 %v2368_v51 }
  0x7a   :  { %2179 = vmatprep.subr.bf16.mxu0 %v2375_v53  ;;  %2212 = vmatpush3.bf16.msra.mxu1 %v2368_v51 }
  0x7b   :  { %1289 = vmatmul.mubr.bf16.gmra.mrb[44].mxu0 %v2352_v52  ;;  %2205 = vmatprep.subr.bf16.mxu1 %v2375_v53 }
  0x7c   :  { %1386 = vmatmul.mubr.bf16.gmra.mrb[44].mxu1 %v2353_v54  ;;  %1296 = vmatprep.mubr.bf16.mxu0 %v2355_v55 }
  0x7d   :  { %1393 = vmatprep.mubr.bf16.mxu1 %v2357_v56  ;;  %2180 = vmatpush3.bf16.msra.mxu0 %v2375_v53 }
  0x7e   :  { %2181 = vmatprep.subr.bf16.mxu0 %v2382_v57  ;;  %2213 = vmatpush3.bf16.msra.mxu1 %v2375_v53 }
  0x7f   :  { %2206 = vmatprep.subr.bf16.mxu1 %v2382_v57 }
  0x81   :  { %2182 = vmatpush3.bf16.msra.mxu0 %v2382_v57 }
  0x82   :  { %2214 = vmatpush3.bf16.msra.mxu1 %v2382_v57 }
  0x83   :  { %1297 = vmatmul.mubr.bf16.gmra.mrb[48].mxu0 %v2359_v58 }
  0x84   :  { %1394 = vmatmul.mubr.bf16.gmra.mrb[48].mxu1 %v2360_v59  ;;  %1304 = vmatprep.mubr.bf16.mxu0 %v2362_v60 }
  0x85   :  { %1401 = vmatprep.mubr.bf16.mxu1 %v2364_v61 }
  0x8b   :  { %1305 = vmatmul.mubr.bf16.gmra.mrb[52].mxu0 %v2366_v62 }
  0x8c   :  { %1402 = vmatmul.mubr.bf16.gmra.mrb[52].mxu1 %v2367_v63  ;;  %1312 = vmatprep.mubr.bf16.mxu0 %v2369_v0 }
  0x8d   :  { %1409 = vmatprep.mubr.bf16.mxu1 %v2371_v1 }
  0x93   :  { %1313 = vmatmul.mubr.bf16.gmra.mrb[56].mxu0 %v2373_v2 }
  0x94   :  { %1410 = vmatmul.mubr.bf16.gmra.mrb[56].mxu1 %v2374_v3  ;;  %1320 = vmatprep.mubr.bf16.mxu0 %v2376_v4 }
  0x95   :  { %1417 = vmatprep.mubr.bf16.mxu1 %v2378_v5 }
  0x9b   :  { %1321 = vmatmul.mubr.bf16.gmra.mrb[60].mxu0 %v2380_v6 }
  0x9c   :  { %1418 = vmatmul.mubr.bf16.gmra.mrb[60].mxu1 %v2381_v7  ;;  %2183 = vmatprep.mubr.bf16.mxu0 %v2383_v8 }
  0x9d   :  { %2191 = vmatprep.mubr.bf16.mxu1 %v2384_v9 }
  0xa3   :  { %2184 = vmatmul.mubr.bf16.vlgmr.msra.gmra.mrb[64].mxu0 %v2385_v10 }
  0xa4   :  { %2192 = vmatmul.mubr.bf16.vlgmr.msra.gmra.mrb[64].mxu1 %v2386_v11  ;;  %2187 = vmatprep.mubr.bf16.mxu0 %v2387_v12 }
  0xa5   :  { %2195 = vmatprep.mubr.bf16.mxu1 %v2388_v13 }
  0xab   :  { %2188 = vmatmul.mubr.bf16.gmra.mrb[68].mxu0 %v2389_v14 }
  0xac   :  { %2196 = vmatmul.mubr.bf16.gmra.mrb[68].mxu1 %v2390_v15 }
  0xf6   :  { %v1911_v16 = vpop.f32.mrb[0].mxu0 }
  0xf7   :  { %v1975_v17 = vpop.f32.mrb[0].mxu1  ;;  %v1912_v18 = vpop.f32.mrb[1].mxu0 }
  0xf8   :  { %v1913_v19 = vadd.f32 %v1912_v18, %v1911_v16  ;;  %v1976_v20 = vpop.f32.mrb[1].mxu1  ;;  %v1914_v21 = vpop.f32.mrb[2].mxu0 }
  0xf9   :  { %v1977_v22 = vadd.f32 %v1976_v20, %v1975_v17  ;;  %v1978_v23 = vpop.f32.mrb[2].mxu1  ;;  %v1915_v24 = vpop.f32.mrb[3].mxu0 }
  0xfa   :  { %v1916_v25 = vadd.f32 %v1915_v24, %v1914_v21  ;;  %v1979_v26 = vpop.f32.mrb[3].mxu1 }
  0xfb   :  { %v2843_v27 = vadd.f32 %v1977_v22, %v1913_v19  ;;  %v1980_v28 = vadd.f32 %v1979_v26, %v1978_v23 }
  0xfd   :  { %v2845_v29 = vadd.f32 %v1980_v28, %v1916_v25 }
  0xfe   :  { %v1917_v30 = vpop.f32.mrb[4].mxu0 }
  0xff   :  { %v1981_v31 = vpop.f32.mrb[4].mxu1  ;;  %v1918_v32 = vpop.f32.mrb[5].mxu0 }
 0x100   :  { %v1919_v33 = vadd.f32 %v1918_v32, %v1917_v30  ;;  %v1982_v34 = vpop.f32.mrb[5].mxu1  ;;  %v1920_v35 = vpop.f32.mrb[6].mxu0 }
 0x101   :  { %v1983_v36 = vadd.f32 %v1982_v34, %v1981_v31  ;;  %v1984_v37 = vpop.f32.mrb[6].mxu1  ;;  %v1921_v38 = vpop.f32.mrb[7].mxu0 }
 0x102   :  { %v1922_v39 = vadd.f32 %v1921_v38, %v1920_v35  ;;  %v1985_v40 = vpop.f32.mrb[7].mxu1 }
 0x103   :  { %v2847_v41 = vadd.f32 %v1983_v36, %v1919_v33  ;;  %v1986_v42 = vadd.f32 %v1985_v40, %v1984_v37 }
 0x105   :  { %v2849_v43 = vadd.f32 %v1986_v42, %v1922_v39 }
 0x106   :  { %v1923_v44 = vpop.f32.mrb[8].mxu0 }
 0x107   :  { %v1987_v45 = vpop.f32.mrb[8].mxu1  ;;  %v1924_v46 = vpop.f32.mrb[9].mxu0 }
 0x108   :  { %v1925_v47 = vadd.f32 %v1924_v46, %v1923_v44  ;;  %v1988_v48 = vpop.f32.mrb[9].mxu1  ;;  %v1926_v49 = vpop.f32.mrb[10].mxu0 }
 0x109   :  { %v1989_v50 = vadd.f32 %v1988_v48, %v1987_v45  ;;  %v1990_v51 = vpop.f32.mrb[10].mxu1  ;;  %v1927_v52 = vpop.f32.mrb[11].mxu0 }
 0x10a   :  { %v1928_v53 = vadd.f32 %v1927_v52, %v1926_v49  ;;  %v1991_v54 = vpop.f32.mrb[11].mxu1 }
 0x10b   :  { %v2851_v55 = vadd.f32 %v1989_v50, %v1925_v47  ;;  %v1992_v56 = vadd.f32 %v1991_v54, %v1990_v51 }
 0x10d   :  { %v2853_v57 = vadd.f32 %v1992_v56, %v1928_v53 }
 0x10e   :  { %v1929_v58 = vpop.f32.mrb[12].mxu0 }
 0x10f   :  { %v1993_v59 = vpop.f32.mrb[12].mxu1  ;;  %v1930_v60 = vpop.f32.mrb[13].mxu0 }
 0x110   :  { %v1931_v61 = vadd.f32 %v1930_v60, %v1929_v58  ;;  %v1994_v62 = vpop.f32.mrb[13].mxu1  ;;  %v1932_v63 = vpop.f32.mrb[14].mxu0 }
 0x111   :  { %v1995_v0 = vadd.f32 %v1994_v62, %v1993_v59  ;;  %v1996_v1 = vpop.f32.mrb[14].mxu1  ;;  %v1933_v2 = vpop.f32.mrb[15].mxu0 }
 0x112   :  { %v1934_v3 = vadd.f32 %v1933_v2, %v1932_v63  ;;  %v1997_v4 = vpop.f32.mrb[15].mxu1 }
 0x113   :  { %v2855_v5 = vadd.f32 %v1995_v0, %v1931_v61  ;;  %v1998_v6 = vadd.f32 %v1997_v4, %v1996_v1 }
 0x115   :  { %v2857_v7 = vadd.f32 %v1998_v6, %v1934_v3 }
 0x116   :  { %v1935_v8 = vpop.f32.mrb[16].mxu0 }
 0x117   :  { %v1999_v9 = vpop.f32.mrb[16].mxu1  ;;  %v1936_v10 = vpop.f32.mrb[17].mxu0 }
 0x118   :  { %v1937_v11 = vadd.f32 %v1936_v10, %v1935_v8  ;;  %v2000_v12 = vpop.f32.mrb[17].mxu1  ;;  %v1938_v13 = vpop.f32.mrb[18].mxu0 }
 0x119   :  { %v2001_v14 = vadd.f32 %v2000_v12, %v1999_v9  ;;  %v2002_v15 = vpop.f32.mrb[18].mxu1  ;;  %v1939_v16 = vpop.f32.mrb[19].mxu0 }
 0x11a   :  { %v1940_v17 = vadd.f32 %v1939_v16, %v1938_v13  ;;  %v2003_v18 = vpop.f32.mrb[19].mxu1 }
 0x11b   :  { %v2859_v19 = vadd.f32 %v2001_v14, %v1937_v11  ;;  %v2004_v20 = vadd.f32 %v2003_v18, %v2002_v15 }
 0x11d   :  { %v2861_v21 = vadd.f32 %v2004_v20, %v1940_v17 }
 0x11e   :  { %v1941_v22 = vpop.f32.mrb[20].mxu0 }
 0x11f   :  { %v2005_v23 = vpop.f32.mrb[20].mxu1  ;;  %v1942_v24 = vpop.f32.mrb[21].mxu0 }
 0x120   :  { %v1943_v25 = vadd.f32 %v1942_v24, %v1941_v22  ;;  %v2006_v26 = vpop.f32.mrb[21].mxu1  ;;  %v1944_v28 = vpop.f32.mrb[22].mxu0 }
 0x121   :  { %v2007_v30 = vadd.f32 %v2006_v26, %v2005_v23  ;;  %v2008_v31 = vpop.f32.mrb[22].mxu1  ;;  %v1945_v32 = vpop.f32.mrb[23].mxu0 }
 0x122   :  { %v1946_v33 = vadd.f32 %v1945_v32, %v1944_v28  ;;  %v2009_v34 = vpop.f32.mrb[23].mxu1 }
 0x123   :  { %v2863_v35 = vadd.f32 %v2007_v30, %v1943_v25  ;;  %v2010_v36 = vadd.f32 %v2009_v34, %v2008_v31 }
 0x125   :  { %v2865_v37 = vadd.f32 %v2010_v36, %v1946_v33 }
 0x126   :  { %v1947_v38 = vpop.f32.mrb[24].mxu0 }
 0x127   :  { %v2011_v39 = vpop.f32.mrb[24].mxu1  ;;  %v1948_v40 = vpop.f32.mrb[25].mxu0 }
 0x128   :  { %v1949_v42 = vadd.f32 %v1948_v40, %v1947_v38  ;;  %v2012_v44 = vpop.f32.mrb[25].mxu1  ;;  %v1950_v45 = vpop.f32.mrb[26].mxu0 }
 0x129   :  { %v2013_v46 = vadd.f32 %v2012_v44, %v2011_v39  ;;  %v2014_v47 = vpop.f32.mrb[26].mxu1  ;;  %v1951_v48 = vpop.f32.mrb[27].mxu0 }
 0x12a   :  { %v1952_v49 = vadd.f32 %v1951_v48, %v1950_v45  ;;  %v2015_v50 = vpop.f32.mrb[27].mxu1 }
 0x12b   :  { %v2867_v51 = vadd.f32 %v2013_v46, %v1949_v42  ;;  %v2016_v52 = vadd.f32 %v2015_v50, %v2014_v47 }
 0x12d   :  { %v2869_v53 = vadd.f32 %v2016_v52, %v1952_v49 }
 0x12e   :  { %v1953_v54 = vpop.f32.mrb[28].mxu0 }
 0x12f   :  { %v2017_v56 = vpop.f32.mrb[28].mxu1  ;;  %v1954_v58 = vpop.f32.mrb[29].mxu0 }
 0x130   :  { %v1955_v59 = vadd.f32 %v1954_v58, %v1953_v54  ;;  %v2018_v60 = vpop.f32.mrb[29].mxu1  ;;  %v1956_v61 = vpop.f32.mrb[30].mxu0 }
 0x131   :  { %v2019_v62 = vadd.f32 %v2018_v60, %v2017_v56  ;;  %v2020_v63 = vpop.f32.mrb[30].mxu1  ;;  %v1957_v0 = vpop.f32.mrb[31].mxu0 }
 0x132   :  { %v1958_v1 = vadd.f32 %v1957_v0, %v1956_v61  ;;  %v2021_v2 = vpop.f32.mrb[31].mxu1 }
 0x133   :  { %v2871_v3 = vadd.f32 %v2019_v62, %v1955_v59  ;;  %v2022_v4 = vadd.f32 %v2021_v2, %v2020_v63 }
 0x135   :  { %v2873_v6 = vadd.f32 %v2022_v4, %v1958_v1 }
 0x136   :  { %v2039_v8 = vpop.f32.mrb[32].mxu0 }
 0x137   :  { %v2040_v9 = vpop.f32.mrb[33].mxu0  ;;  %v2103_v10 = vpop.f32.mrb[32].mxu1 }
 0x138   :  { %v2041_v11 = vadd.f32 %v2040_v9, %v2039_v8  ;;  %v2042_v12 = vpop.f32.mrb[34].mxu0  ;;  %v2104_v13 = vpop.f32.mrb[33].mxu1 }
 0x139   :  { %v2043_v14 = vpop.f32.mrb[35].mxu0  ;;  %v2105_v15 = vadd.f32 %v2104_v13, %v2103_v10  ;;  %v2106_v16 = vpop.f32.mrb[34].mxu1 }
 0x13a   :  { %v1267_v17 = vadd.f32 %v2041_v11, %v2843_v27  ;;  %v2044_v18 = vadd.f32 %v2043_v14, %v2042_v12  ;;  %v2107_v20 = vpop.f32.mrb[35].mxu1 }
 0x13b   :  { %v2108_v22 = vadd.f32 %v2107_v20, %v2106_v16 }
 0x13c   :  { %v1270_v23 = vadd.f32 %v2044_v18, %v2845_v29  ;;  %v2877_v24 = vadd.f32 %v2105_v15, %v1267_v17 }
 0x13e   :  { %v2045_v25 = vpop.f32.mrb[36].mxu0  ;;  %v2879_v26 = vadd.f32 %v2108_v22, %v1270_v23 }
 0x13f   :  { %v2046_v28 = vpop.f32.mrb[37].mxu0  ;;  %v2109_v30 = vpop.f32.mrb[36].mxu1 }
 0x140   :  { %v2047_v31 = vadd.f32 %v2046_v28, %v2045_v25  ;;  %v2048_v32 = vpop.f32.mrb[38].mxu0  ;;  %v2110_v33 = vpop.f32.mrb[37].mxu1 }
 0x141   :  { %v2049_v34 = vpop.f32.mrb[39].mxu0  ;;  %v2111_v36 = vadd.f32 %v2110_v33, %v2109_v30  ;;  %v2112_v38 = vpop.f32.mrb[38].mxu1 }
 0x142   :  { %v1275_v27 = vadd.f32 %v2047_v31, %v2847_v41  ;;  %v2050_v39 = vadd.f32 %v2049_v34, %v2048_v32  ;;  %v2113_v40 = vpop.f32.mrb[39].mxu1 }
 0x143   :  { %v2114_v42 = vadd.f32 %v2113_v40, %v2112_v38 }
 0x144   :  { %v1278_v29 = vadd.f32 %v2050_v39, %v2849_v43  ;;  %v2883_v44 = vadd.f32 %v2111_v36, %v1275_v27 }
 0x146   :  { %v2051_v45 = vpop.f32.mrb[40].mxu0  ;;  %v2885_v46 = vadd.f32 %v2114_v42, %v1278_v29 }
 0x147   :  { %v2052_v47 = vpop.f32.mrb[41].mxu0  ;;  %v2115_v48 = vpop.f32.mrb[40].mxu1 }
 0x148   :  { %v2053_v49 = vadd.f32 %v2052_v47, %v2051_v45  ;;  %v2054_v50 = vpop.f32.mrb[42].mxu0  ;;  %v2116_v52 = vpop.f32.mrb[41].mxu1 }
 0x149   :  { %v2055_v54 = vpop.f32.mrb[43].mxu0  ;;  %v2117_v56 = vadd.f32 %v2116_v52, %v2115_v48  ;;  %v2118_v58 = vpop.f32.mrb[42].mxu1 }
 0x14a   :  { %v1283_v41 = vadd.f32 %v2053_v49, %v2851_v55  ;;  %v2056_v59 = vadd.f32 %v2055_v54, %v2054_v50  ;;  %v2119_v60 = vpop.f32.mrb[43].mxu1 }
 0x14b   :  { %v2120_v61 = vadd.f32 %v2119_v60, %v2118_v58 }
 0x14c   :  { %v1286_v43 = vadd.f32 %v2056_v59, %v2853_v57  ;;  %v2889_v62 = vadd.f32 %v2117_v56, %v1283_v41 }
 0x14e   :  { %v2057_v63 = vpop.f32.mrb[44].mxu0  ;;  %v2891_v0 = vadd.f32 %v2120_v61, %v1286_v43 }
 0x14f   :  { %v2058_v1 = vpop.f32.mrb[45].mxu0  ;;  %v2121_v2 = vpop.f32.mrb[44].mxu1 }
 0x150   :  { %v2059_v4 = vadd.f32 %v2058_v1, %v2057_v63  ;;  %v2060_v8 = vpop.f32.mrb[46].mxu0  ;;  %v2122_v9 = vpop.f32.mrb[45].mxu1 }
 0x151   :  { %v2061_v10 = vpop.f32.mrb[47].mxu0  ;;  %v2123_v11 = vadd.f32 %v2122_v9, %v2121_v2  ;;  %v2124_v12 = vpop.f32.mrb[46].mxu1 }
 0x152   :  { %v1291_v55 = vadd.f32 %v2059_v4, %v2855_v5  ;;  %v2062_v13 = vadd.f32 %v2061_v10, %v2060_v8  ;;  %v2125_v14 = vpop.f32.mrb[47].mxu1 }
 0x153   :  { %v2126_v15 = vadd.f32 %v2125_v14, %v2124_v12 }
 0x154   :  { %v1294_v57 = vadd.f32 %v2062_v13, %v2857_v7  ;;  %v2895_v16 = vadd.f32 %v2123_v11, %v1291_v55 }
 0x156   :  { %v2063_v17 = vpop.f32.mrb[48].mxu0  ;;  %v2897_v18 = vadd.f32 %v2126_v15, %v1294_v57 }
 0x157   :  { %v2064_v20 = vpop.f32.mrb[49].mxu0  ;;  %v2127_v22 = vpop.f32.mrb[48].mxu1 }
 0x158   :  { %v2065_v23 = vadd.f32 %v2064_v20, %v2063_v17  ;;  %v2066_v25 = vpop.f32.mrb[50].mxu0  ;;  %v2128_v28 = vpop.f32.mrb[49].mxu1 }
 0x159   :  { %v2067_v30 = vpop.f32.mrb[51].mxu0  ;;  %v2129_v31 = vadd.f32 %v2128_v28, %v2127_v22  ;;  %v2130_v32 = vpop.f32.mrb[50].mxu1 }
 0x15a   :  { %v1299_v5 = vadd.f32 %v2065_v23, %v2859_v19  ;;  %v2068_v33 = vadd.f32 %v2067_v30, %v2066_v25  ;;  %v2131_v34 = vpop.f32.mrb[51].mxu1 }
 0x15b   :  { %v2132_v36 = vadd.f32 %v2131_v34, %v2130_v32 }
 0x15c   :  { %v1302_v7 = vadd.f32 %v2068_v33, %v2861_v21  ;;  %v1396_v38 = vadd.f32 %v2129_v31, %v1299_v5 }
 0x15e   :  { %v2069_v27 = vpop.f32.mrb[52].mxu0  ;;  %v2901_v39 = vadd.f32 %v2132_v36, %v1302_v7 }
 0x15f   :  { %v2070_v40 = vpop.f32.mrb[53].mxu0  ;;  %v2133_v42 = vpop.f32.mrb[52].mxu1 }
 0x160   :  { %v2071_v29 = vadd.f32 %v2070_v40, %v2069_v27  ;;  %v2072_v45 = vpop.f32.mrb[54].mxu0  ;;  %v2134_v47 = vpop.f32.mrb[53].mxu1 }
 0x161   :  { %v2073_v48 = vpop.f32.mrb[55].mxu0  ;;  %v2135_v49 = vadd.f32 %v2134_v47, %v2133_v42  ;;  %v2136_v50 = vpop.f32.mrb[54].mxu1 }
 0x162   :  { %v1307_v52 = vadd.f32 %v2071_v29, %v2863_v35  ;;  %v2074_v19 = vadd.f32 %v2073_v48, %v2072_v45  ;;  %v2137_v54 = vpop.f32.mrb[55].mxu1 }
 0x163   :  { %v2138_v56 = vadd.f32 %v2137_v54, %v2136_v50 }
 0x164   :  { %v1310_v58 = vadd.f32 %v2074_v19, %v2865_v37  ;;  %v1404_v21 = vadd.f32 %v2135_v49, %v1307_v52 }
 0x166   :  { %v2075_v41 = vpop.f32.mrb[56].mxu0  ;;  %v1407_v59 = vadd.f32 %v2138_v56, %v1310_v58 }
 0x167   :  { %v2076_v60 = vpop.f32.mrb[57].mxu0  ;;  %v2139_v61 = vpop.f32.mrb[56].mxu1 }
 0x168   :  { %v2077_v43 = vadd.f32 %v2076_v60, %v2075_v41  ;;  %v2078_v63 = vpop.f32.mrb[58].mxu0  ;;  %v2140_v1 = vpop.f32.mrb[57].mxu1 }
 0x169   :  { %v2079_v2 = vpop.f32.mrb[59].mxu0  ;;  %v2141_v4 = vadd.f32 %v2140_v1, %v2139_v61  ;;  %v2142_v8 = vpop.f32.mrb[58].mxu1 }
 0x16a   :  { %v1315_v9 = vadd.f32 %v2077_v43, %v2867_v51  ;;  %v2080_v10 = vadd.f32 %v2079_v2, %v2078_v63  ;;  %v2143_v35 = vpop.f32.mrb[59].mxu1 }
 0x16b   :  { %v2144_v11 = vadd.f32 %v2143_v35, %v2142_v8 }
 0x16c   :  { %v1318_v12 = vadd.f32 %v2080_v10, %v2869_v53  ;;  %v1412_v55 = vadd.f32 %v2141_v4, %v1315_v9 }
 0x16e   :  { %v2081_v37 = vpop.f32.mrb[60].mxu0  ;;  %v2907_v13 = vadd.f32 %v2144_v11, %v1318_v12 }
 0x16f   :  { %v2082_v14 = vpop.f32.mrb[61].mxu0  ;;  %v2145_v15 = vpop.f32.mrb[60].mxu1 }
 0x170   :  { %v2083_v57 = vadd.f32 %v2082_v14, %v2081_v37  ;;  %v2084_v17 = vpop.f32.mrb[62].mxu0  ;;  %v2146_v20 = vpop.f32.mrb[61].mxu1 }
 0x171   :  { %v2085_v22 = vpop.f32.mrb[63].mxu0  ;;  %v2147_v23 = vadd.f32 %v2146_v20, %v2145_v15  ;;  %v2148_v25 = vpop.f32.mrb[62].mxu1 }
 0x172   :  { %v1323_v28 = vadd.f32 %v2083_v57, %v2871_v3  ;;  %v2086_v51 = vadd.f32 %v2085_v22, %v2084_v17  ;;  %v2149_v30 = vpop.f32.mrb[63].mxu1 }
 0x173   :  { %v2150_v31 = vadd.f32 %v2149_v30, %v2148_v25 }
 0x174   :  { %v1326_v32 = vadd.f32 %v2086_v51, %v2873_v6  ;;  %v1420_v53 = vadd.f32 %v2147_v23, %v1323_v28 }
 0x176   :  { %v2185_v5 = vpop.f32.mrb[64].mxu0  ;;  %v1423_v33 = vadd.f32 %v2150_v31, %v1326_v32 }
 0x177   :  { %v1469_v34 = vadd.f32 %v2185_v5, %v2883_v44  ;;  %v2193_v36 = vpop.f32.mrb[64].mxu1  ;;  %v1460_v7 = vpop.f32.mrb[65].mxu0 }
 0x178   :  { %v2912_v27 = vadd.f32 %v2193_v36, %v1404_v21  ;;  %v1461_v40 = vadd.f32 %v1460_v7, %v2877_v24  ;;  %v1492_v42 = vpop.f32.mrb[65].mxu1  ;;  %v2186_v29 = vpop.f32.mrb[66].mxu0 }
 0x179   :  { %v2915_v45 = vadd.f32 %v1492_v42, %v1396_v38  ;;  %v1472_v3 = vadd.f32 %v2186_v29, %v2885_v46  ;;  %v2194_v47 = vpop.f32.mrb[66].mxu1  ;;  %v1463_v48 = vpop.f32.mrb[67].mxu0  ;;  %v1626_v58 = vmul.f32 %v1469_v34, %v1469_v34 }
 0x17a   :  { %v2918_v6 = vadd.f32 %v2194_v47, %v1407_v59  ;;  %v1464_v49 = vadd.f32 %v1463_v48, %v2879_v26  ;;  %v1495_v50 = vpop.f32.mrb[67].mxu1  ;;  %v1624_v56 = vmul.f32 %v1461_v40, %v1461_v40  ;;  %v1634_v7 = vmul.f32 %v2912_v27, %v2912_v27 }
 0x17b   :  { %v1856_v44 = vpack.c.bf16 %v1472_v3, %v1469_v34  ;;  %v1496_v52 = vadd.f32 %v1495_v50, %v2901_v39  ;;  %v1627_v4 = vmul.f32 %v1472_v3, %v1472_v3  ;;  %v1632_v32 = vmul.f32 %v2915_v45, %v2915_v45 }
 0x17c   :  { %v1876_v19 = vpack.c.bf16 %v2918_v6, %v2912_v27  ;;  %v1851_v24 = vpack.c.bf16 %v1464_v49, %v1461_v40  ;;  %v1603_v54 = vadd.f32 %v1464_v49, %v1461_v40  ;;  %v1625_v46 = vmul.f32 %v1464_v49, %v1464_v49 }
 0x17d   :  { %1888 = vst [vmem:[%s2968_s2 + $0x8] sm:$0xff] %v1856_v44   ;;  %v1871_v38 = vpack.c.bf16 %v1496_v52, %v2915_v45  ;;  %v1635_v29 = vmul.f32 %v2918_v6, %v2918_v6 }
 0x17e   :  { %1892 = vst [vmem:[%s2968_s2 + $0x28] sm:$0xff] %v1876_v19   ;;  %1852 = vst [vmem:[%s2968_s2] sm:$0xff] %v1851_v24   ;;  %v1604_v26 = vadd.f32 %v1603_v54, %v1469_v34  ;;  %v2189_v39 = vpop.f32.mrb[68].mxu0  ;;  %v1640_v21 = vadd.f32 %v1625_v46, %v1624_v56 }
 0x17f   :  { %1891 = vst [vmem:[%s2968_s2 + $0x20] sm:$0xff] %v1871_v38   ;;  %v1485_v41 = vadd.f32 %v2189_v39, %v2895_v16  ;;  %v2197_v59 = vpop.f32.mrb[68].mxu1  ;;  %v1476_v60 = vpop.f32.mrb[69].mxu0 }
 0x180   :  { %v1517_v61 = vadd.f32 %v2197_v59, %v1420_v53  ;;  %v1477_v43 = vadd.f32 %v1476_v60, %v2889_v62  ;;  %v1605_v63 = vadd.f32 %v1604_v26, %v1472_v3  ;;  %v1508_v1 = vpop.f32.mrb[69].mxu1  ;;  %v2190_v2 = vpop.f32.mrb[70].mxu0  ;;  %v1641_v8 = vadd.f32 %v1640_v21, %v1626_v58 }
 0x181   :  { %v1509_v9 = vadd.f32 %v1508_v1, %v1412_v55  ;;  %v1488_v10 = vadd.f32 %v2190_v2, %v2897_v18  ;;  %v2198_v35 = vpop.f32.mrb[70].mxu1  ;;  %v1479_v11 = vpop.f32.mrb[71].mxu0  ;;  %v1630_v28 = vmul.f32 %v1485_v41, %v1485_v41 }
 0x182   :  { %v1606_v12 = vadd.f32 %v1605_v63, %v1477_v43  ;;  %v1628_v37 = vmul.f32 %v1477_v43, %v1477_v43  ;;  %v1520_v14 = vadd.f32 %v2198_v35, %v1423_v33  ;;  %v1511_v15 = vpop.f32.mrb[71].mxu1  ;;  %v1642_v16 = vadd.f32 %v1641_v8, %v1627_v4 }
 0x183   :  { %v1866_v57 = vpack.c.bf16 %v1488_v10, %v1485_v41  ;;  %v1480_v20 = vadd.f32 %v1479_v11, %v2891_v0  ;;  %v1512_v62 = vadd.f32 %v1511_v15, %v2907_v13  ;;  %v1631_v51 = vmul.f32 %v1488_v10, %v1488_v10 }
 0x184   :  { %v1886_v17 = vpack.c.bf16 %v1520_v14, %v1517_v61  ;;  %v1643_v22 = vadd.f32 %v1642_v16, %v1628_v37  ;;  %v1633_v33 = vmul.f32 %v1496_v52, %v1496_v52  ;;  %v1636_v48 = vmul.f32 %v1509_v9, %v1509_v9 }
 0x185   :  { %1890 = vst [vmem:[%s2968_s2 + $0x18] sm:$0xff] %v1866_v57   ;;  %v1861_v18 = vpack.c.bf16 %v1480_v20, %v1477_v43  ;;  %v1607_v55 = vadd.f32 %v1606_v12, %v1480_v20  ;;  %v1629_v23 = vmul.f32 %v1480_v20, %v1480_v20  ;;  %v1881_v25 = vpack.c.bf16 %v1512_v62, %v1509_v9 }
 0x186   :  { %1894 = vst [vmem:[%s2968_s2 + $0x38] sm:$0xff] %v1886_v17   ;;  %v1637_v44 = vmul.f32 %v1512_v62, %v1512_v62  ;;  %v1638_v24 = vmul.f32 %v1517_v61, %v1517_v61  ;;  %v1639_v56 = vmul.f32 %v1520_v14, %v1520_v14 }
 0x187   :  { %1889 = vst [vmem:[%s2968_s2 + $0x10] sm:$0xff] %v1861_v18   ;;  %v1608_v0 = vadd.f32 %v1607_v55, %v1485_v41  ;;  %v1644_v13 = vadd.f32 %v1643_v22, %v1629_v23  ;;  %1893 = vst [vmem:[%s2968_s2 + $0x30] sm:$0xff] %v1881_v25  }
 0x189   :  { %v1609_v30 = vadd.f32 %v1608_v0, %v1488_v10  ;;  %v1645_v31 = vadd.f32 %v1644_v13, %v1630_v28 }
 0x18b   :  { %v1610_v53 = vadd.f32 %v1609_v30, %v2915_v45  ;;  %v1646_v5 = vadd.f32 %v1645_v31, %v1631_v51 }
 0x18d   :  { %v1647_v34 = vadd.f32 %v1646_v5, %v1632_v32  ;;  %v1611_v36 = vadd.f32 %v1610_v53, %v1496_v52 }
 0x18f   :  { %v1612_v40 = vadd.f32 %v1611_v36, %v2912_v27  ;;  %v1648_v42 = vadd.f32 %v1647_v34, %v1633_v33 }
 0x191   :  { %v1613_v3 = vadd.f32 %v1612_v40, %v2918_v6  ;;  %v1649_v47 = vadd.f32 %v1648_v42, %v1634_v7 }
 0x193   :  { %v1614_v49 = vadd.f32 %v1613_v3, %v1509_v9  ;;  %v1650_v50 = vadd.f32 %v1649_v47, %v1635_v29 }
 0x195   :  { %v1615_v45 = vadd.f32 %v1614_v49, %v1512_v62  ;;  %v1651_v19 = vadd.f32 %v1650_v50, %v1636_v48 }
 0x197   :  { %v1616_v52 = vadd.f32 %v1615_v45, %v1517_v61  ;;  %v1652_v54 = vadd.f32 %v1651_v19, %v1637_v44 }
 0x199   :  { %v1617_v46 = vadd.f32 %v1616_v52, %v1520_v14  ;;  %v1653_v38 = vadd.f32 %v1652_v54, %v1638_v24 }
 0x19b   :  { %v1618_v27 = vrot.slane %v1617_v46, 4  ;;  %v1654_v26 = vadd.f32 %v1653_v38, %v1639_v56 }
 0x19d   :  { %v1619_v39 = vadd.f32 %v1618_v27, %v1617_v46  ;;  %v1655_v58 = vrot.slane %v1654_v26, 4 }
 0x19f   :  { %v1620_v21 = vrot.slane %v1619_v39, 2  ;;  %v1656_v41 = vadd.f32 %v1655_v58, %v1654_v26 }
 0x1a1   :  { %v1621_v6 = vadd.f32 %v1620_v21, %v1619_v39  ;;  %v1657_v59 = vrot.slane %v1656_v41, 2 }
 0x1a3   :  { %v1622_v60 = vrot.slane %v1621_v6, 1  ;;  %v1658_v43 = vadd.f32 %v1657_v59, %v1656_v41 }
 0x1a5   :  { %v1659_v63 = vrot.slane %v1658_v43, 1  ;;  %v1623_v1 = vadd.f32 %v1622_v60, %v1621_v6 }
 0x1a7   :  { %v1660_v2 = vadd.f32 %v1659_v63, %v1658_v43 }
 0x1a9   :  { %v1662_v4 = vsel %vm1661_vm0, %v1623_v1, %v1660_v2 }
 0x1aa   :  { %1663 = vst [vmem:[%s2969_s3] sm:$0x3] %v1662_v4 }

// kernel: encoder_block_forward.8
= control target key start
LH: loop header
LB: loop body
LE: loop exit
PB: predicated region body
PF: predicated region fallthrough
CT: control target
= control target key end

     0   :  { %vm295_vm0 = vcmask 1040384   ;;  %s464_s1 = inlined_call_operand.vmem [shape: bf16[128,128], index: 1, kind: input, shape index: {}]   ;;  %s465_s0 = inlined_call_operand.vmem [shape: bf16[128,128], index: 0, kind: input, shape index: {}]   ;;  %s466_s2 = inlined_call_operand.vmem [shape: f32[1,2,128], index: 2, kind: output, shape index: {}]  }
   0x1   :  { %v382_v0 = vld [vmem:[%s464_s1] sm:$0xff]   ;;  %v383_v1 = vld [vmem:[%s464_s1 + $0x8] sm:$0xff]   ;;  %v384_v2 = vld [vmem:[%s464_s1 + $0x10] sm:$0xff]  }
   0x2   :  { %334 = vmatprep.subr.bf16.mxu0 %v382_v0  ;;  %366 = vmatprep.subr.bf16.mxu1 %v382_v0  ;;  %v385_v3 = vld [vmem:[%s464_s1 + $0x18] sm:$0xff]   ;;  %v390_v4 = vld [vmem:[%s465_s0] sm:$0xff]   ;;  %v387_v7 = vld [vmem:[%s464_s1 + $0x28] sm:$0xff]  }
   0x3   :  { %335 = vmatpush3.bf16.msra.mxu0 %v382_v0  ;;  %374 = vmatpush3.bf16.msra.mxu1 %v382_v0  ;;  %v386_v5 = vld [vmem:[%s464_s1 + $0x20] sm:$0xff]   ;;  %v388_v8 = vld [vmem:[%s464_s1 + $0x30] sm:$0xff]   ;;  %v389_v9 = vld [vmem:[%s464_s1 + $0x38] sm:$0xff]  }
   0x4   :  { %336 = vmatprep.subr.bf16.mxu0 %v383_v1  ;;  %367 = vmatprep.subr.bf16.mxu1 %v383_v1  ;;  %v394_v6 = vld [vmem:[%s465_s0 + $0x20] sm:$0xff]   ;;  %v391_v10 = vld [vmem:[%s465_s0 + $0x8] sm:$0xff]   ;;  %v392_v12 = vld [vmem:[%s465_s0 + $0x10] sm:$0xff]  }
   0x5   :  { %350 = vmatprep.mubr.bf16.mxu0 %v390_v4  ;;  %358 = vmatprep.mubr.bf16.mxu1 %v394_v6  ;;  %v395_v11 = vld [vmem:[%s465_s0 + $0x28] sm:$0xff]   ;;  %v396_v13 = vld [vmem:[%s465_s0 + $0x30] sm:$0xff]   ;;  %v393_v14 = vld [vmem:[%s465_s0 + $0x18] sm:$0xff]  }
   0x6   :  { %v397_v15 = vld [vmem:[%s465_s0 + $0x38] sm:$0xff]  }
   0x7   :  { %337 = vmatpush3.bf16.msra.mxu0 %v383_v1  ;;  %375 = vmatpush3.bf16.msra.mxu1 %v383_v1 }
   0x8   :  { %338 = vmatprep.subr.bf16.mxu0 %v384_v2  ;;  %368 = vmatprep.subr.bf16.mxu1 %v384_v2 }
   0xb   :  { %339 = vmatpush3.bf16.msra.mxu0 %v384_v2  ;;  %376 = vmatpush3.bf16.msra.mxu1 %v384_v2 }
   0xc   :  { %340 = vmatprep.subr.bf16.mxu0 %v385_v3  ;;  %369 = vmatprep.subr.bf16.mxu1 %v385_v3 }
   0xf   :  { %341 = vmatpush3.bf16.msra.mxu0 %v385_v3  ;;  %377 = vmatpush3.bf16.msra.mxu1 %v385_v3 }
  0x10   :  { %342 = vmatprep.subr.bf16.mxu0 %v386_v5  ;;  %370 = vmatprep.subr.bf16.mxu1 %v386_v5 }
  0x13   :  { %343 = vmatpush3.bf16.msra.mxu0 %v386_v5  ;;  %378 = vmatpush3.bf16.msra.mxu1 %v386_v5 }
  0x14   :  { %344 = vmatprep.subr.bf16.mxu0 %v387_v7  ;;  %371 = vmatprep.subr.bf16.mxu1 %v387_v7 }
  0x17   :  { %345 = vmatpush3.bf16.msra.mxu0 %v387_v7  ;;  %379 = vmatpush3.bf16.msra.mxu1 %v387_v7 }
  0x18   :  { %346 = vmatprep.subr.bf16.mxu0 %v388_v8  ;;  %372 = vmatprep.subr.bf16.mxu1 %v388_v8 }
  0x1b   :  { %347 = vmatpush3.bf16.msra.mxu0 %v388_v8  ;;  %380 = vmatpush3.bf16.msra.mxu1 %v388_v8 }
  0x1c   :  { %348 = vmatprep.subr.bf16.mxu0 %v389_v9  ;;  %373 = vmatprep.subr.bf16.mxu1 %v389_v9 }
  0x1f   :  { %349 = vmatpush3.bf16.msra.mxu0 %v389_v9  ;;  %381 = vmatpush3.bf16.msra.mxu1 %v389_v9 }
  0x22   :  { %351 = vmatmul.mubr.bf16.vlgmr.msra.gmra.mrb[0].mxu0 %v391_v10  ;;  %359 = vmatmul.mubr.bf16.vlgmr.msra.gmra.mrb[0].mxu1 %v395_v11 }
  0x23   :  { %354 = vmatprep.mubr.bf16.mxu0 %v392_v12  ;;  %362 = vmatprep.mubr.bf16.mxu1 %v396_v13 }
  0x2a   :  { %355 = vmatmul.mubr.bf16.gmra.mrb[4].mxu0 %v393_v14  ;;  %363 = vmatmul.mubr.bf16.gmra.mrb[4].mxu1 %v397_v15 }
  0xf5   :  { %v352_v16 = vpop.f32.mrb[0].mxu0  ;;  %v360_v17 = vpop.f32.mrb[0].mxu1 }
  0xf6   :  { %v174_v18 = vpop.f32.mrb[1].mxu0  ;;  %v206_v19 = vpop.f32.mrb[1].mxu1  ;;  %v260_v27 = vmul.f32 %v352_v16, %v352_v16  ;;  %v268_v59 = vmul.f32 %v360_v17, %v360_v17 }
  0xf7   :  { %v353_v20 = vpop.f32.mrb[2].mxu0  ;;  %v361_v21 = vpop.f32.mrb[2].mxu1  ;;  %v258_v24 = vmul.f32 %v174_v18, %v174_v18  ;;  %v266_v53 = vmul.f32 %v206_v19, %v206_v19 }
  0xf8   :  { %v177_v22 = vpop.f32.mrb[3].mxu0  ;;  %v209_v23 = vpop.f32.mrb[3].mxu1  ;;  %v261_v30 = vmul.f32 %v353_v20, %v353_v20  ;;  %v269_v62 = vmul.f32 %v361_v21, %v361_v21 }
  0xf9   :  { %v237_v25 = vadd.f32 %v177_v22, %v174_v18  ;;  %v259_v26 = vmul.f32 %v177_v22, %v177_v22  ;;  %v267_v58 = vmul.f32 %v209_v23, %v209_v23 }
  0xfb   :  { %v238_v28 = vadd.f32 %v352_v16, %v237_v25  ;;  %v274_v29 = vadd.f32 %v259_v26, %v258_v24 }
  0xfd   :  { %v275_v31 = vadd.f32 %v274_v29, %v260_v27  ;;  %v356_v32 = vpop.f32.mrb[4].mxu0  ;;  %v239_v33 = vadd.f32 %v353_v20, %v238_v28  ;;  %v364_v34 = vpop.f32.mrb[4].mxu1 }
  0xfe   :  { %v190_v35 = vpop.f32.mrb[5].mxu0  ;;  %v222_v36 = vpop.f32.mrb[5].mxu1  ;;  %v264_v47 = vmul.f32 %v356_v32, %v356_v32  ;;  %v272_v7 = vmul.f32 %v364_v34, %v364_v34 }
  0xff   :  { %v240_v37 = vadd.f32 %v239_v33, %v190_v35  ;;  %v262_v38 = vmul.f32 %v190_v35, %v190_v35  ;;  %v276_v39 = vadd.f32 %v275_v31, %v261_v30  ;;  %v357_v40 = vpop.f32.mrb[6].mxu0  ;;  %v365_v41 = vpop.f32.mrb[6].mxu1  ;;  %v270_v1 = vmul.f32 %v222_v36, %v222_v36 }
 0x100   :  { %v193_v42 = vpop.f32.mrb[7].mxu0  ;;  %v225_v43 = vpop.f32.mrb[7].mxu1  ;;  %v265_v50 = vmul.f32 %v357_v40, %v357_v40  ;;  %v273_v10 = vmul.f32 %v365_v41, %v365_v41 }
 0x101   :  { %v277_v44 = vadd.f32 %v276_v39, %v262_v38  ;;  %v241_v45 = vadd.f32 %v240_v37, %v193_v42  ;;  %v263_v46 = vmul.f32 %v193_v42, %v193_v42  ;;  %v271_v6 = vmul.f32 %v225_v43, %v225_v43 }
 0x103   :  { %v242_v48 = vadd.f32 %v356_v32, %v241_v45  ;;  %v278_v49 = vadd.f32 %v277_v44, %v263_v46 }
 0x105   :  { %v279_v51 = vadd.f32 %v278_v49, %v264_v47  ;;  %v243_v52 = vadd.f32 %v357_v40, %v242_v48 }
 0x107   :  { %v244_v54 = vadd.f32 %v243_v52, %v206_v19  ;;  %v280_v55 = vadd.f32 %v279_v51, %v265_v50 }
 0x109   :  { %v281_v56 = vadd.f32 %v280_v55, %v266_v53  ;;  %v245_v57 = vadd.f32 %v244_v54, %v209_v23 }
 0x10b   :  { %v246_v60 = vadd.f32 %v360_v17, %v245_v57  ;;  %v282_v61 = vadd.f32 %v281_v56, %v267_v58 }
 0x10d   :  { %v283_v63 = vadd.f32 %v282_v61, %v268_v59  ;;  %v247_v0 = vadd.f32 %v361_v21, %v246_v60 }
 0x10f   :  { %v248_v2 = vadd.f32 %v247_v0, %v222_v36  ;;  %v284_v3 = vadd.f32 %v283_v63, %v269_v62 }
 0x111   :  { %v285_v4 = vadd.f32 %v284_v3, %v270_v1  ;;  %v249_v5 = vadd.f32 %v248_v2, %v225_v43 }
 0x113   :  { %v250_v8 = vadd.f32 %v364_v34, %v249_v5  ;;  %v286_v9 = vadd.f32 %v285_v4, %v271_v6 }
 0x115   :  { %v251_v11 = vadd.f32 %v365_v41, %v250_v8  ;;  %v287_v12 = vadd.f32 %v286_v9, %v272_v7 }
 0x117   :  { %v252_v13 = vrot.slane %v251_v11, 4  ;;  %v288_v14 = vadd.f32 %v287_v12, %v273_v10 }
 0x119   :  { %v253_v15 = vadd.f32 %v252_v13, %v251_v11  ;;  %v289_v16 = vrot.slane %v288_v14, 4 }
 0x11b   :  { %v254_v17 = vrot.slane %v253_v15, 2  ;;  %v290_v18 = vadd.f32 %v289_v16, %v288_v14 }
 0x11d   :  { %v255_v19 = vadd.f32 %v254_v17, %v253_v15  ;;  %v291_v20 = vrot.slane %v290_v18, 2 }
 0x11f   :  { %v256_v21 = vrot.slane %v255_v19, 1  ;;  %v292_v22 = vadd.f32 %v291_v20, %v290_v18 }
 0x121   :  { %v293_v23 = vrot.slane %v292_v22, 1  ;;  %v257_v24 = vadd.f32 %v256_v21, %v255_v19 }
 0x123   :  { %v294_v25 = vadd.f32 %v293_v23, %v292_v22 }
 0x125   :  { %v296_v26 = vsel %vm295_vm0, %v257_v24, %v294_v25 }
 0x126   :  { %297 = vst [vmem:[%s466_s2] sm:$0x3] %v296_v26 }

// kernel: encoder_block_forward.9
= control target key start
LH: loop header
LB: loop body
LE: loop exit
PB: predicated region body
PF: predicated region fallthrough
CT: control target
= control target key end

     0   :  { %s806_s0 = inlined_call_operand.vmem [shape: bf16[128,128], index: 0, kind: input, shape index: {}]   ;;  %s807_s1 = inlined_call_operand.vmem [shape: f32[1,128], index: 1, kind: input, shape index: {}]   ;;  %s808_s2 = inlined_call_operand.vmem [shape: f32[1,128], index: 2, kind: input, shape index: {}]   ;;  %s809_s3 = inlined_call_operand.vmem [shape: bf16[128,128], index: 3, kind: input, shape index: {}]   ;;  %s810_s4 = inlined_call_operand.vmem [shape: bf16[128,128], index: 4, kind: input, shape index: {}]   ;;  %s811_s5 = inlined_call_operand.vmem [shape: f32[1,128], index: 5, kind: input, shape index: {}]   ;;  %s812_s6 = inlined_call_operand.vmem [shape: f32[1,128], index: 6, kind: input, shape index: {}]   ;;  %s813_s7 = inlined_call_operand.hbm [shape: f32[128,128], index: 7, kind: output, shape index: {}]  }
   0x1   :  { %v567_v0 = vld [vmem:[%s810_s4] sm:$0xff]   ;;  %v568_v1 = vld [vmem:[%s810_s4 + $0x8] sm:$0xff]   ;;  %v569_v2 = vld [vmem:[%s810_s4 + $0x10] sm:$0xff]  }
   0x2   :  { %516 = vmatprep.subr.bf16.mxu0 %v567_v0  ;;  %548 = vmatprep.subr.bf16.mxu1 %v567_v0  ;;  %v570_v3 = vld [vmem:[%s810_s4 + $0x18] sm:$0xff]   ;;  %v575_v4 = vld [vmem:[%s809_s3] sm:$0xff]   ;;  %v572_v7 = vld [vmem:[%s810_s4 + $0x28] sm:$0xff]  }
   0x3   :  { %517 = vmatpush3.bf16.msra.mxu0 %v567_v0  ;;  %556 = vmatpush3.bf16.msra.mxu1 %v567_v0  ;;  %v576_v5 = vld [vmem:[%s809_s3 + $0x20] sm:$0xff]  }
   0x4   :  { %518 = vmatprep.subr.bf16.mxu0 %v568_v1  ;;  %549 = vmatprep.subr.bf16.mxu1 %v568_v1  ;;  %v571_v6 = vld [vmem:[%s810_s4 + $0x20] sm:$0xff]  }
   0x5   :  { %532 = vmatprep.mubr.bf16.mxu0 %v575_v4  ;;  %540 = vmatprep.mubr.bf16.mxu1 %v576_v5 }
   0x7   :  { %519 = vmatpush3.bf16.msra.mxu0 %v568_v1  ;;  %557 = vmatpush3.bf16.msra.mxu1 %v568_v1 }
   0x8   :  { %520 = vmatprep.subr.bf16.mxu0 %v569_v2  ;;  %550 = vmatprep.subr.bf16.mxu1 %v569_v2 }
   0xb   :  { %521 = vmatpush3.bf16.msra.mxu0 %v569_v2  ;;  %558 = vmatpush3.bf16.msra.mxu1 %v569_v2 }
   0xc   :  { %522 = vmatprep.subr.bf16.mxu0 %v570_v3  ;;  %551 = vmatprep.subr.bf16.mxu1 %v570_v3 }
   0xf   :  { %523 = vmatpush3.bf16.msra.mxu0 %v570_v3  ;;  %559 = vmatpush3.bf16.msra.mxu1 %v570_v3 }
  0x10   :  { %524 = vmatprep.subr.bf16.mxu0 %v571_v6  ;;  %552 = vmatprep.subr.bf16.mxu1 %v571_v6 }
  0x11   :  { %12 = vsyncpa [#allocation3], 0  ;;  %v573_v8 = vld [vmem:[%s810_s4 + $0x30] sm:$0xff]   ;;  %v574_v9 = vld [vmem:[%s810_s4 + $0x38] sm:$0xff]  }
  0x12   :  { %v577_v10 = vld [vmem:[%s809_s3 + $0x8] sm:$0xff]   ;;  %v579_v12 = vld [vmem:[%s809_s3 + $0x10] sm:$0xff]   ;;  %v581_v14 = vld [vmem:[%s809_s3 + $0x18] sm:$0xff]  }
  0x13   :  { %525 = vmatpush3.bf16.msra.mxu0 %v571_v6  ;;  %560 = vmatpush3.bf16.msra.mxu1 %v571_v6  ;;  %v578_v11 = vld [vmem:[%s809_s3 + $0x28] sm:$0xff]   ;;  %v580_v13 = vld [vmem:[%s809_s3 + $0x30] sm:$0xff]   ;;  %v582_v15 = vld [vmem:[%s809_s3 + $0x38] sm:$0xff]  }
  0x14   :  { %526 = vmatprep.subr.bf16.mxu0 %v572_v7  ;;  %553 = vmatprep.subr.bf16.mxu1 %v572_v7  ;;  %v493_v16 = vld [vmem:[%s806_s0 + $0x8] sm:$0xff]   ;;  %v462_v18 = vld [vmem:[%s806_s0] sm:$0xff]   ;;  %v495_v20 = vld [vmem:[%s806_s0 + $0x18] sm:$0xff]  }
  0x15   :  { %v497_v17 = vld [vmem:[%s806_s0 + $0x28] sm:$0xff]   ;;  %v496_v19 = vld [vmem:[%s806_s0 + $0x20] sm:$0xff]   ;;  %v467_v21 = vunpack.c.l.bf16 %v493_v16  ;;  %v499_v23 = vld [vmem:[%s806_s0 + $0x38] sm:$0xff]   ;;  %v463_v27 = vunpack.c.l.bf16 %v462_v18  ;;  %v468_v29 = vunpack.c.h.bf16 %v493_v16  ;;  %v464_v31 = vunpack.c.h.bf16 %v462_v18 }
  0x16   :  { %v483_v22 = vunpack.c.l.bf16 %v497_v17  ;;  %v494_v24 = vld [vmem:[%s806_s0 + $0x10] sm:$0xff]   ;;  %v441_v26 = vld [vmem:[%s807_s1] ss:$0 sm:$0xff]  ;;  %v479_v28 = vunpack.c.l.bf16 %v496_v19  ;;  %v484_v30 = vunpack.c.h.bf16 %v497_v17  ;;  %v480_v32 = vunpack.c.h.bf16 %v496_v19 }
  0x17   :  { %527 = vmatpush3.bf16.msra.mxu0 %v572_v7  ;;  %561 = vmatpush3.bf16.msra.mxu1 %v572_v7  ;;  %v498_v25 = vld [vmem:[%s806_s0 + $0x30] sm:$0xff]   ;;  %v475_v33 = vunpack.c.l.bf16 %v495_v20  ;;  %v491_v34 = vunpack.c.l.bf16 %v499_v23  ;;  %v471_v35 = vunpack.c.l.bf16 %v494_v24  ;;  %v69_v37 = vmul.f32 %v467_v21, %v441_v26  ;;  %v442_v41 = vld [vmem:[%s808_s2] ss:$0 sm:$0xff] }
  0x18   :  { %528 = vmatprep.subr.bf16.mxu0 %v573_v8  ;;  %554 = vmatprep.subr.bf16.mxu1 %v573_v8  ;;  %v487_v36 = vunpack.c.l.bf16 %v498_v25  ;;  %v77_v38 = vmul.f32 %v483_v22, %v441_v26  ;;  %v476_v39 = vunpack.c.h.bf16 %v495_v20  ;;  %v492_v40 = vunpack.c.h.bf16 %v499_v23  ;;  %v731_v58 = vld [vmem:[%s811_s5] ss:$0 sm:$0xff] }
  0x19   :  { %v67_v42 = vmul.f32 %v463_v27, %v441_v26  ;;  %v75_v43 = vmul.f32 %v479_v28, %v441_v26  ;;  %v472_v44 = vunpack.c.h.bf16 %v494_v24  ;;  %v488_v45 = vunpack.c.h.bf16 %v498_v25 }
  0x1a   :  { %v70_v46 = vmul.f32 %v468_v29, %v441_v26  ;;  %v78_v47 = vmul.f32 %v484_v30, %v441_v26  ;;  %v68_v48 = vmul.f32 %v464_v31, %v441_v26  ;;  %v76_v49 = vmul.f32 %v480_v32, %v441_v26 }
  0x1b   :  { %529 = vmatpush3.bf16.msra.mxu0 %v573_v8  ;;  %562 = vmatpush3.bf16.msra.mxu1 %v573_v8  ;;  %v73_v50 = vmul.f32 %v475_v33, %v441_v26  ;;  %v81_v51 = vmul.f32 %v491_v34, %v441_v26  ;;  %v71_v52 = vmul.f32 %v471_v35, %v441_v26 }
  0x1c   :  { %530 = vmatprep.subr.bf16.mxu0 %v574_v9  ;;  %555 = vmatprep.subr.bf16.mxu1 %v574_v9  ;;  %v79_v53 = vmul.f32 %v487_v36, %v441_v26  ;;  %v92_v54 = vadd.f32 %v442_v41, %v69_v37  ;;  %v100_v55 = vadd.f32 %v442_v41, %v77_v38 }
  0x1d   :  { %v74_v56 = vmul.f32 %v476_v39, %v441_v26  ;;  %v82_v57 = vmul.f32 %v492_v40, %v441_v26  ;;  %v90_v59 = vadd.f32 %v442_v41, %v67_v42  ;;  %v98_v60 = vadd.f32 %v442_v41, %v75_v43 }
  0x1e   :  { %v72_v61 = vmul.f32 %v472_v44, %v441_v26  ;;  %v80_v62 = vmul.f32 %v488_v45, %v441_v26  ;;  %v93_v63 = vadd.f32 %v442_v41, %v70_v46  ;;  %v101_v0 = vadd.f32 %v442_v41, %v78_v47 }
  0x1f   :  { %531 = vmatpush3.bf16.msra.mxu0 %v574_v9  ;;  %563 = vmatpush3.bf16.msra.mxu1 %v574_v9  ;;  %v91_v1 = vadd.f32 %v442_v41, %v68_v48  ;;  %v99_v2 = vadd.f32 %v442_v41, %v76_v49  ;;  %v733_v5 = vadd.f32 %v442_v41, %v73_v50 }
  0x20   :  { %v735_v6 = vadd.f32 %v442_v41, %v81_v51  ;;  %v737_v7 = vadd.f32 %v442_v41, %v71_v52  ;;  %v739_v8 = vadd.f32 %v442_v41, %v79_v53  ;;  %v754_v20 = vadd.f32 %v442_v41, %v72_v61 }
  0x21   :  { %v756_v21 = vadd.f32 %v442_v41, %v80_v62 }
  0x22   :  { %533 = vmatmul.mubr.bf16.vlgmr.msra.gmra.mrb[0].mxu0 %v577_v10  ;;  %541 = vmatmul.mubr.bf16.vlgmr.msra.gmra.mrb[0].mxu1 %v578_v11 }
  0x23   :  { %536 = vmatprep.mubr.bf16.mxu0 %v579_v12  ;;  %544 = vmatprep.mubr.bf16.mxu1 %v580_v13  ;;  %v743_v13 = vadd.f32 %v442_v41, %v74_v56 }
  0x2a   :  { %537 = vmatmul.mubr.bf16.gmra.mrb[4].mxu0 %v581_v14  ;;  %545 = vmatmul.mubr.bf16.gmra.mrb[4].mxu1 %v582_v15  ;;  %v745_v14 = vadd.f32 %v442_v41, %v82_v57  ;;  %v750_v15 = vld [vmem:[%s812_s6] ss:$0 sm:$0xff]  ;;  %s607_s6 = smov [#allocation2]  }
  0x2b   :  { %s430_s4 = sshll.u32 %s607_s6, 4  ;;  %s431_s4 = int_to_ptr.vmem [resolvable:$true] %s430_s4 }
  0x2c   :  { %s583_s28 = scalar_lea.vmem %s431_s4, 2048  ;;  %p588_p1 = scmp.lt.s32.totalorder %s431_s4, %s431_s4 }
  0x2d   :  { %p584_p0 = scmp.ne.s32.totalorder %s431_s4, %s583_s28  ;;  %p589_p2 = scmp.lt.s32.totalorder %s583_s28, %s583_s28 }
  0x2f   :  { %p590_p3 = por %p589_p2, %p588_p1 }
  0x31   :  { %p591_p4 = pnand %p590_p3, %p584_p0 }
  0xf5   :  { %v534_v3 = vpop.f32.mrb[0].mxu0  ;;  %v542_v4 = vpop.f32.mrb[0].mxu1 }
  0xf6   :  { %v340_v9 = vmul.f32 %v534_v3, %v731_v58  ;;  %v348_v10 = vmul.f32 %v542_v4, %v731_v58  ;;  %v268_v11 = vpop.f32.mrb[1].mxu0  ;;  %v300_v12 = vpop.f32.mrb[1].mxu1 }
  0xf7   :  { %v338_v16 = vmul.f32 %v731_v58, %v268_v11  ;;  %v346_v17 = vmul.f32 %v731_v58, %v300_v12  ;;  %v535_v18 = vpop.f32.mrb[2].mxu0  ;;  %v543_v19 = vpop.f32.mrb[2].mxu1 }
  0xf8   :  { %v356_v22 = vadd.f32 %v340_v9, %v92_v54  ;;  %v364_v23 = vadd.f32 %v348_v10, %v100_v55  ;;  %v341_v24 = vmul.f32 %v535_v18, %v731_v58  ;;  %v349_v25 = vmul.f32 %v543_v19, %v731_v58  ;;  %v271_v26 = vpop.f32.mrb[3].mxu0  ;;  %v303_v27 = vpop.f32.mrb[3].mxu1 }
  0xf9   :  { %v354_v28 = vadd.f32 %v338_v16, %v90_v59  ;;  %v362_v29 = vadd.f32 %v346_v17, %v98_v60  ;;  %v339_v30 = vmul.f32 %v731_v58, %v271_v26  ;;  %v347_v31 = vmul.f32 %v731_v58, %v303_v27 }
  0xfa   :  { %v379_v32 = vadd.f32 %v750_v15, %v356_v22  ;;  %v387_v33 = vadd.f32 %v750_v15, %v364_v23  ;;  %v357_v34 = vadd.f32 %v341_v24, %v93_v63  ;;  %v365_v35 = vadd.f32 %v349_v25, %v101_v0 }
  0xfb   :  { %v377_v36 = vadd.f32 %v750_v15, %v354_v28  ;;  %v385_v37 = vadd.f32 %v750_v15, %v362_v29  ;;  %v355_v38 = vadd.f32 %v339_v30, %v91_v1  ;;  %v363_v39 = vadd.f32 %v347_v31, %v99_v2 }
  0xfc   :  { %v395_v40 = vmax.f32 %v379_v32, 0.0  ;;  %v403_v41 = vmax.f32 %v387_v33, 0.0  ;;  %v380_v42 = vadd.f32 %v750_v15, %v357_v34  ;;  %v388_v43 = vadd.f32 %v750_v15, %v365_v35 }
  0xfd   :  { %v393_v44 = vmax.f32 %v377_v36, 0.0  ;;  %v401_v45 = vmax.f32 %v385_v37, 0.0  ;;  %v378_v46 = vadd.f32 %v750_v15, %v355_v38  ;;  %v386_v47 = vadd.f32 %v750_v15, %v363_v39  ;;  %v538_v48 = vpop.f32.mrb[4].mxu0  ;;  %v546_v49 = vpop.f32.mrb[4].mxu1 }
  0xfe   :  { %411 = vst [vmem:[#allocation2 + $0x10] sm:$0xff] %v395_v40  ;;  %419 = vst [vmem:[#allocation2 + $0x50] sm:$0xff] %v403_v41  ;;  %v396_v50 = vmax.f32 %v380_v42, 0.0  ;;  %v404_v51 = vmax.f32 %v388_v43, 0.0  ;;  %v344_v52 = vmul.f32 %v538_v48, %v731_v58  ;;  %v352_v53 = vmul.f32 %v546_v49, %v731_v58  ;;  %v284_v54 = vpop.f32.mrb[5].mxu0  ;;  %v316_v55 = vpop.f32.mrb[5].mxu1 }
  0xff   :  { %409 = vst [vmem:[#allocation2] sm:$0xff] %v393_v44  ;;  %417 = vst [vmem:[#allocation2 + $0x40] sm:$0xff] %v401_v45  ;;  %v394_v56 = vmax.f32 %v378_v46, 0.0  ;;  %v402_v57 = vmax.f32 %v386_v47, 0.0  ;;  %v342_v59 = vmul.f32 %v731_v58, %v284_v54  ;;  %v350_v60 = vmul.f32 %v731_v58, %v316_v55  ;;  %v539_v61 = vpop.f32.mrb[6].mxu0  ;;  %v547_v62 = vpop.f32.mrb[6].mxu1 }
 0x100   :  { %412 = vst [vmem:[#allocation2 + $0x18] sm:$0xff] %v396_v50  ;;  %420 = vst [vmem:[#allocation2 + $0x58] sm:$0xff] %v404_v51  ;;  %v360_v63 = vadd.f32 %v344_v52, %v733_v5  ;;  %v368_v0 = vadd.f32 %v352_v53, %v735_v6  ;;  %v345_v1 = vmul.f32 %v539_v61, %v731_v58  ;;  %v287_v3 = vpop.f32.mrb[7].mxu0  ;;  %v319_v4 = vpop.f32.mrb[7].mxu1 }
 0x101   :  { %v353_v2 = vmul.f32 %v547_v62, %v731_v58  ;;  %410 = vst [vmem:[#allocation2 + $0x8] sm:$0xff] %v394_v56  ;;  %418 = vst [vmem:[#allocation2 + $0x48] sm:$0xff] %v402_v57  ;;  %v358_v9 = vadd.f32 %v342_v59, %v737_v7  ;;  %v366_v10 = vadd.f32 %v350_v60, %v739_v8 }
 0x102   :  { %v343_v11 = vmul.f32 %v731_v58, %v287_v3  ;;  %v351_v12 = vmul.f32 %v731_v58, %v319_v4  ;;  %v383_v5 = vadd.f32 %v750_v15, %v360_v63  ;;  %v391_v6 = vadd.f32 %v750_v15, %v368_v0 }
 0x103   :  { %v361_v16 = vadd.f32 %v345_v1, %v743_v13  ;;  %v369_v17 = vadd.f32 %v353_v2, %v745_v14  ;;  %v381_v18 = vadd.f32 %v750_v15, %v358_v9  ;;  %v389_v19 = vadd.f32 %v750_v15, %v366_v10 }
 0x104   :  { %v359_v7 = vadd.f32 %v343_v11, %v754_v20  ;;  %v367_v8 = vadd.f32 %v351_v12, %v756_v21  ;;  %v399_v22 = vmax.f32 %v383_v5, 0.0  ;;  %v407_v58 = vmax.f32 %v391_v6, 0.0 }
 0x105   :  { %v384_v23 = vadd.f32 %v750_v15, %v361_v16  ;;  %v392_v24 = vadd.f32 %v750_v15, %v369_v17  ;;  %v397_v25 = vmax.f32 %v381_v18, 0.0  ;;  %v405_v13 = vmax.f32 %v389_v19, 0.0 }
 0x106   :  { %v382_v14 = vadd.f32 %v750_v15, %v359_v7  ;;  %v390_v26 = vadd.f32 %v750_v15, %v367_v8  ;;  %415 = vst [vmem:[#allocation2 + $0x30] sm:$0xff] %v399_v22  ;;  %423 = vst [vmem:[#allocation2 + $0x70] sm:$0xff] %v407_v58 }
 0x107   :  { %v400_v27 = vmax.f32 %v384_v23, 0.0  ;;  %v408_v20 = vmax.f32 %v392_v24, 0.0  ;;  %413 = vst [vmem:[#allocation2 + $0x20] sm:$0xff] %v397_v25  ;;  %421 = vst [vmem:[#allocation2 + $0x60] sm:$0xff] %v405_v13 }
 0x108   :  { %v398_v21 = vmax.f32 %v382_v14, 0.0  ;;  %v406_v28 = vmax.f32 %v390_v26, 0.0 }
 0x109   :  { %416 = vst [vmem:[#allocation2 + $0x38] sm:$0xff] %v400_v27  ;;  %424 = vst [vmem:[#allocation2 + $0x78] sm:$0xff] %v408_v20 }
 0x10a   :  { %414 = vst [vmem:[#allocation2 + $0x28] sm:$0xff] %v398_v21  ;;  %422 = vst [vmem:[#allocation2 + $0x68] sm:$0xff] %v406_v28 }
 0x10b   :  { %594 = shalt.err (!%p591_p4)
}
 0x10c   :  { %s595_s8 = scalar_lea.hbm %s813_s7, 2048 }
 0x10d   :  { %p596_p5 = scmp.ne.s32.totalorder %s813_s7, %s595_s8  ;;  %p599_p6 = scmp.lt.u32.totalorder %s595_s8, %s813_s7 }
 0x10f   :  { %p601_p7 = pnand %p599_p6, %p596_p5 }
 0x111   :  { %604 = shalt.err (!%p601_p7)
}
 0x112   :  { %s608_s13 = smov 128   ;;  %s609_s14 = smov 8  }
 0x113   :  { %436 = dma.vmem_to_hbm [thread:$0]  %s431_s4, 2048, %s813_s7, [#allocation3], %s608_s13, %s608_s13, %s609_s14  }
 0x114   :  { %605 = dma.done.wait [#allocation3], 2048  }
 0x115   :  { %606 = vsyncadd [#allocation3], 4294965248 }
 0x116   :  { %440 = vsyncpa [#allocation3], 1 }

</bundles_post_ra>
